<compile_context>
chip_gen: v6e
topology: v6e:2x2x1
jax: 0.10.0
libtpu: 0.0.40
codegen_flags: <defaults>
</compile_context>

<pallas_src>
import math

import jax
import jax.numpy as jnp
from jax.experimental import pallas as pl
from jax.experimental.pallas import tpu as pltpu

# ---------------- config (small, RoBERTa-like) ----------------
VOCAB      = 100
HIDDEN     = 32
NUM_HEADS  = 4
HEAD_DIM   = HIDDEN // NUM_HEADS
INTER      = 64
NUM_LAYERS = 2
MAX_POS    = 64
NUM_CLASS  = 5
LN_EPS     = 1e-5
BIAS_W     = 3 * HIDDEN          # packed-bias row width (96)


# ---------------- in-kernel helpers ----------------
def _layernorm(x, g, b):
    mu = jnp.mean(x, axis=-1, keepdims=True)
    var = jnp.mean((x - mu) ** 2, axis=-1, keepdims=True)
    return (x - mu) * jax.lax.rsqrt(var + LN_EPS) * g + b


def _gelu(x):
    # TODO(synk): HF RoBERTa uses exact erf-GELU; tanh approximation used here.
    return 0.5 * x * (1.0 + jnp.tanh(0.7978845608028654 * (x + 0.044715 * x * x * x)))


# ---------------- fused Pallas kernel (whole forward) ----------------
def roberta_fused_kernel(ids_ref, mask_ref,
                         word_emb_ref, pos_emb_ref, type_emb_ref, emb_ln_ref,
                         w_qkv_ref, w_o_ref, w_i_ref, w_f_ref,
                         b_all_ref, ln_all_ref,
                         w_pool_ref, b_pool_ref, w_out_ref, b_out_ref,
                         o_ref):
    B, _, S = mask_ref.shape
    BS = ids_ref.shape[0]
    H = HIDDEN

    # ---- embeddings: word (one-hot f32 matmul, exact) + pos + token-type ----
    # TODO(synk): HF RoBERTa derives position ids from non-pad tokens
    # (padding_idx aware); here positions are a plain arange(S) + 2.
    onehot = (ids_ref[...] ==
              jax.lax.broadcasted_iota(jnp.int32, (BS, VOCAB), 1)).astype(jnp.float32)
    we = jnp.dot(onehot, word_emb_ref[...], preferred_element_type=jnp.float32)  # [BS,H]
    pe = pos_emb_ref[2:2 + S, :] + type_emb_ref[...]                              # [S,H]
    x = we + jnp.tile(pe, (B, 1))
    x = _layernorm(x, emb_ln_ref[0:1, :], emb_ln_ref[1:2, :])
    # embedding dropout: identity (inference semantics)

    # additive key mask, computed in-kernel: [B, 1, S]
    mask_add = (1.0 - mask_ref[...]) * -1e9

    # ---- encoder layers (static unroll over NUM_LAYERS) ----
    for l in range(NUM_LAYERS):
        b_all = b_all_ref[l]                      # [4, 96]  rows: bqkv | bo | bi | bf
        ln = ln_all_ref[l]                        # [4, H]   rows: ln1g|ln1b|ln2g|ln2b

        # fused QKV projection (1/sqrt(d) pre-folded into the Q block & q bias)
        qkv = jnp.dot(x.astype(jnp.bfloat16), w_qkv_ref[l],
                      preferred_element_type=jnp.float32) + b_all[0:1, :]

        # per-head scores (batched over B), concatenated along the query axis
        # so mask-add + softmax happen ONCE for all heads.
        s_list = []
        for h in range(NUM_HEADS):
            lo = h * HEAD_DIM
            qh = qkv[:, lo:lo + HEAD_DIM].reshape(B, S, HEAD_DIM)
            kh = qkv[:, H + lo:H + lo + HEAD_DIM].reshape(B, S, HEAD_DIM)
            s_list.append(jnp.einsum('bqd,bkd->bqk', qh, kh,
                                     preferred_element_type=jnp.float32))
        s_all = jnp.concatenate(s_list, axis=1) + mask_add          # [B, nh*S, S]
        s_all = s_all - jnp.max(s_all, axis=-1, keepdims=True)
        p_all = jnp.exp(s_all)
        # NOTE: if a query row ever has every key masked, sum==0 -> Inf/NaN;
        # fine for the all-ones mask used here (matches reference behaviour).
        p_all = p_all * pl.reciprocal(jnp.sum(p_all, axis=-1, keepdims=True),
                                      approx=False)

        # per-head contexts (bf16 MXU feed), lane-packed -> single output proj
        ctx_list = []
        for h in range(NUM_HEADS):
            lo = h * HEAD_DIM
            vh = qkv[:, 2 * H + lo:2 * H + lo + HEAD_DIM].reshape(B, S, HEAD_DIM)
            ph = p_all[:, h * S:(h + 1) * S, :]
            ctx_list.append(
                jnp.einsum('bqk,bkd->bqd', ph.astype(jnp.bfloat16),
                           vh.astype(jnp.bfloat16),
                           preferred_element_type=jnp.float32).reshape(BS, HEAD_DIM))
        ctx = jnp.concatenate(ctx_list, axis=-1)                    # [BS, H]
        attn = jnp.dot(ctx.astype(jnp.bfloat16), w_o_ref[l],
                       preferred_element_type=jnp.float32) + b_all[1:2, :H]
        h1 = _layernorm(x + attn, ln[0:1, :], ln[1:2, :])

        # feed-forward
        ff = _gelu(jnp.dot(h1.astype(jnp.bfloat16), w_i_ref[l],
                           preferred_element_type=jnp.float32) + b_all[2:3, :INTER])
        ff2 = jnp.dot(ff.astype(jnp.bfloat16), w_f_ref[l],
                      preferred_element_type=jnp.float32) + b_all[3:4, :H]
        x = _layernorm(h1 + ff2, ln[2:3, :], ln[3:4, :])

    # ---- RoBERTa pooler: first (<s>) token of each sequence ----
    # Select rows {0, S, 2S, ...} with a tiny one-hot matmul (avoids strided
    # sublane gather / relayout).
    row = jax.lax.broadcasted_iota(jnp.int32, (B, BS), 0)
    col = jax.lax.broadcasted_iota(jnp.int32, (B, BS), 1)
    sel = (col == row * S).astype(jnp.float32)                      # [B, BS]
    cls = jnp.dot(sel, x, preferred_element_type=jnp.float32)       # [B, H]
    pooled = jnp.tanh(jnp.dot(cls, w_pool_ref[...],
                              preferred_element_type=jnp.float32) + b_pool_ref[...])

    # self.drop (p=0.3): identity at inference time
    o_ref[...] = jnp.dot(pooled, w_out_ref[...],
                         preferred_element_type=jnp.float32) + b_out_ref[...]


# ---------------- parameters (deterministic, synthetic, packed) ----------------
def init_params(key):
    counter = [0]

    def nxt():
        counter[0] += 1
        return jax.random.fold_in(key, counter[0])

    def normal(shape):
        return jax.random.normal(nxt(), shape, jnp.float32) * 0.02

    scale = 1.0 / math.sqrt(HEAD_DIM)

    w_qkv, w_o, w_i, w_f, b_all, ln_all = [], [], [], [], [], []
    for _ in range(NUM_LAYERS):
        wq = normal((HIDDEN, HIDDEN))
        wk = normal((HIDDEN, HIDDEN))
        wv = normal((HIDDEN, HIDDEN))
        bq = normal((HIDDEN,))
        bk = normal((HIDDEN,))
        bv = normal((HIDDEN,))
        bo = normal((HIDDEN,))
        bi = normal((INTER,))
        bf = normal((HIDDEN,))
        # fold attention scale into the Q projection (weights AND bias)
        w_qkv.append(jnp.concatenate([wq * scale, wk, wv], axis=1))          # [H, 3H]
        w_o.append(normal((HIDDEN, HIDDEN)))                                 # [H, H]
        w_i.append(normal((HIDDEN, INTER)))
        w_f.append(normal((INTER, HIDDEN)))
        # packed biases: one segment per sublane row, all lane-0 aligned
        b_all.append(jnp.stack([
            jnp.concatenate([bq * scale, bk, bv]),                           # (96,)
            jnp.pad(bo, (0, BIAS_W - HIDDEN)),
            jnp.pad(bi, (0, BIAS_W - INTER)),
            jnp.pad(bf, (0, BIAS_W - HIDDEN)),
        ]))                                                                  # [4, 96]
        ln_all.append(jnp.stack([jnp.ones(HIDDEN), jnp.zeros(HIDDEN),
                                 jnp.ones(HIDDEN), jnp.zeros(HIDDEN)]))      # [4, H]

    return {
        "word_emb": normal((VOCAB, HIDDEN)),
        "pos_emb": normal((MAX_POS, HIDDEN)),
        "type_emb": normal((1, HIDDEN)),
        "emb_ln": jnp.stack([jnp.ones(HIDDEN), jnp.zeros(HIDDEN)]),          # [2, H]
        "w_qkv": jnp.stack(w_qkv).astype(jnp.bfloat16),                      # [L, H, 3H]
        "w_o": jnp.stack(w_o).astype(jnp.bfloat16),                          # [L, H, H]
        "w_i": jnp.stack(w_i).astype(jnp.bfloat16),                          # [L, H, I]
        "w_f": jnp.stack(w_f).astype(jnp.bfloat16),                          # [L, I, H]
        "b_all": jnp.stack(b_all),                                           # [L, 4, 96]
        "ln_all": jnp.stack(ln_all),                                         # [L, 4, H]
        "w_pool": normal((HIDDEN, HIDDEN)),
        "b_pool": normal((1, HIDDEN)),
        "w_out": normal((HIDDEN, NUM_CLASS)),
        "b_out": normal((1, NUM_CLASS)),
    }


# ---------------- forward (single pallas_call, no grid) ----------------
def roberta_pool_classifier_forward(params, input_ids, attention_mask=None):
    B, S = input_ids.shape
    if attention_mask is None:
        attention_mask = jnp.ones((B, S), jnp.float32)

    # Only trivial reshapes/casts happen outside the kernel; the embedding
    # gather and mask arithmetic are done inside it.
    ids2d = input_ids.astype(jnp.int32).reshape(B * S, 1)
    mask3d = attention_mask.astype(jnp.float32).reshape(B, 1, S)

    operands = (ids2d, mask3d,
                params["word_emb"], params["pos_emb"], params["type_emb"],
                params["emb_ln"],
                params["w_qkv"], params["w_o"], params["w_i"], params["w_f"],
                params["b_all"], params["ln_all"],
                params["w_pool"], params["b_pool"], params["w_out"], params["b_out"])

    vmem = pl.BlockSpec(memory_space=pltpu.MemorySpace.VMEM)
    return pl.pallas_call(
        roberta_fused_kernel,
        out_shape=jax.ShapeDtypeStruct((B, NUM_CLASS), jnp.float32),
        in_specs=[vmem] * len(operands),
        out_specs=vmem,
    )(*operands)


if __name__ == "__main__":
    key = jax.random.PRNGKey(0)
    k_ids, k_params = jax.random.split(key)

    B, S = 2, 8
    input_ids = jax.random.randint(k_ids, (B, S), 0, VOCAB, dtype=jnp.int32)
    attention_mask = jnp.ones((B, S), jnp.float32)

    params = init_params(k_params)
    fwd = jax.jit(roberta_pool_classifier_forward)
    out = jax.block_until_ready(fwd(params, input_ids, attention_mask))

    assert out.shape == (B, NUM_CLASS), out.shape
    assert out.dtype == jnp.float32
    assert bool(jnp.all(jnp.isfinite(out)))
    print("KERNEL_OK")
</pallas_src>

<mosaic_0001>
module attributes {stable_mosaic.version = 11 : i64} {
  func.func @roberta_fused_kernel(%arg0: memref<16x1xi32, #tpu.memory_space<vmem>>, %arg1: memref<2x1x8xf32, #tpu.memory_space<vmem>>, %arg2: memref<100x32xf32, #tpu.memory_space<vmem>>, %arg3: memref<64x32xf32, #tpu.memory_space<vmem>>, %arg4: memref<1x32xf32, #tpu.memory_space<vmem>>, %arg5: memref<2x32xf32, #tpu.memory_space<vmem>>, %arg6: memref<2x32x96xbf16, #tpu.memory_space<vmem>>, %arg7: memref<2x32x32xbf16, #tpu.memory_space<vmem>>, %arg8: memref<2x32x64xbf16, #tpu.memory_space<vmem>>, %arg9: memref<2x64x32xbf16, #tpu.memory_space<vmem>>, %arg10: memref<2x4x96xf32, #tpu.memory_space<vmem>>, %arg11: memref<2x4x32xf32, #tpu.memory_space<vmem>>, %arg12: memref<32x32xf32, #tpu.memory_space<vmem>>, %arg13: memref<1x32xf32, #tpu.memory_space<vmem>>, %arg14: memref<32x5xf32, #tpu.memory_space<vmem>>, %arg15: memref<1x5xf32, #tpu.memory_space<vmem>>, %arg16: memref<2x5xf32, #tpu.memory_space<vmem>>) attributes {dimension_semantics = [], scalar_prefetch = 0 : i64, scratch_operands = 0 : i64, tpu.core_type = #tpu.core_type<tc>} {
    %c0 = arith.constant 0 : index
    %c0_0 = arith.constant 0 : index
    %0 = vector.load %arg0[%c0, %c0_0] : memref<16x1xi32, #tpu.memory_space<vmem>>, vector<16x1xi32>
    %1 = tpu.iota {dimensions = array<i32: 1>} : vector<16x100xi32>
    %2 = vector.broadcast %0 : vector<16x1xi32> to vector<16x100xi32>
    %3 = arith.cmpi eq, %2, %1 : vector<16x100xi32>
    %4 = arith.extui %3 : vector<16x100xi1> to vector<16x100xi32>
    %5 = arith.sitofp %4 : vector<16x100xi32> to vector<16x100xf32>
    %c0_1 = arith.constant 0 : index
    %c0_2 = arith.constant 0 : index
    %6 = vector.load %arg2[%c0_1, %c0_2] : memref<100x32xf32, #tpu.memory_space<vmem>>, vector<100x32xf32>
    %cst = arith.constant dense<0.000000e+00> : vector<16x32xf32>
    %7 = tpu.matmul %5, %6, %cst {dimension_numbers = #tpu.dot_dimension_numbers<[1], [0], [0], [1], [0, 0, 1, 1], [], []>} : vector<16x100xf32>, vector<100x32xf32>, vector<16x32xf32> -> vector<16x32xf32>
    %c2 = arith.constant 2 : index
    %c0_3 = arith.constant 0 : index
    %8 = vector.load %arg3[%c2, %c0_3] : memref<64x32xf32, #tpu.memory_space<vmem>>, vector<8x32xf32>
    %c0_4 = arith.constant 0 : index
    %c0_5 = arith.constant 0 : index
    %9 = vector.load %arg4[%c0_4, %c0_5] : memref<1x32xf32, #tpu.memory_space<vmem>>, vector<1x32xf32>
    %10 = vector.broadcast %9 : vector<1x32xf32> to vector<8x32xf32>
    %11 = arith.addf %8, %10 : vector<8x32xf32>
    %12 = tpu.concatenate %11, %11 in 0 : vector<8x32xf32>, vector<8x32xf32> -> vector<16x32xf32>
    %13 = arith.addf %7, %12 : vector<16x32xf32>
    %c0_6 = arith.constant 0 : index
    %c0_7 = arith.constant 0 : index
    %14 = vector.load %arg5[%c0_6, %c0_7] : memref<2x32xf32, #tpu.memory_space<vmem>>, vector<1x32xf32>
    %c1 = arith.constant 1 : index
    %c0_8 = arith.constant 0 : index
    %15 = vector.load %arg5[%c1, %c0_8] : memref<2x32xf32, #tpu.memory_space<vmem>>, vector<1x32xf32>
    %cst_9 = arith.constant dense<0.000000e+00> : vector<16xf32>
    %16 = vector.multi_reduction <add>, %13, %cst_9 [1] : vector<16x32xf32> to vector<16xf32>
    %17 = vector.shape_cast %16 : vector<16xf32> to vector<16x1xf32>
    %cst_10 = arith.constant 3.200000e+01 : f32
    %18 = vector.broadcast %cst_10 : f32 to vector<16x1xf32>
    %19 = arith.divf %17, %18 : vector<16x1xf32>
    %20 = vector.broadcast %19 : vector<16x1xf32> to vector<16x32xf32>
    %21 = arith.subf %13, %20 : vector<16x32xf32>
    %22 = arith.mulf %21, %21 : vector<16x32xf32>
    %cst_11 = arith.constant dense<0.000000e+00> : vector<16xf32>
    %23 = vector.multi_reduction <add>, %22, %cst_11 [1] : vector<16x32xf32> to vector<16xf32>
    %24 = vector.shape_cast %23 : vector<16xf32> to vector<16x1xf32>
    %cst_12 = arith.constant 3.200000e+01 : f32
    %25 = vector.broadcast %cst_12 : f32 to vector<16x1xf32>
    %26 = arith.divf %24, %25 : vector<16x1xf32>
    %27 = vector.broadcast %19 : vector<16x1xf32> to vector<16x32xf32>
    %28 = arith.subf %13, %27 : vector<16x32xf32>
    %cst_13 = arith.constant 9.99999974E-6 : f32
    %29 = vector.broadcast %cst_13 : f32 to vector<16x1xf32>
    %30 = arith.addf %26, %29 : vector<16x1xf32>
    %31 = math.rsqrt %30 : vector<16x1xf32>
    %32 = vector.broadcast %31 : vector<16x1xf32> to vector<16x32xf32>
    %33 = arith.mulf %28, %32 : vector<16x32xf32>
    %34 = vector.broadcast %14 : vector<1x32xf32> to vector<16x32xf32>
    %35 = arith.mulf %33, %34 : vector<16x32xf32>
    %36 = vector.broadcast %15 : vector<1x32xf32> to vector<16x32xf32>
    %37 = arith.addf %35, %36 : vector<16x32xf32>
    %c0_14 = arith.constant 0 : index
    %c0_15 = arith.constant 0 : index
    %c0_16 = arith.constant 0 : index
    %38 = vector.load %arg1[%c0_14, %c0_15, %c0_16] : memref<2x1x8xf32, #tpu.memory_space<vmem>>, vector<2x1x8xf32>
    %cst_17 = arith.constant 1.000000e+00 : f32
    %39 = vector.broadcast %cst_17 : f32 to vector<2x1x8xf32>
    %40 = arith.subf %39, %38 : vector<2x1x8xf32>
    %cst_18 = arith.constant -1.000000e+09 : f32
    %41 = vector.broadcast %cst_18 : f32 to vector<2x1x8xf32>
    %42 = arith.mulf %40, %41 : vector<2x1x8xf32>
    %c0_19 = arith.constant 0 : index
    %c0_20 = arith.constant 0 : index
    %c0_21 = arith.constant 0 : index
    %43 = vector.load %arg10[%c0_19, %c0_20, %c0_21] : memref<2x4x96xf32, #tpu.memory_space<vmem>>, vector<1x4x96xf32>
    %44 = vector.shape_cast %43 : vector<1x4x96xf32> to vector<4x96xf32>
    %c0_22 = arith.constant 0 : index
    %c0_23 = arith.constant 0 : index
    %c0_24 = arith.constant 0 : index
    %45 = vector.load %arg11[%c0_22, %c0_23, %c0_24] : memref<2x4x32xf32, #tpu.memory_space<vmem>>, vector<1x4x32xf32>
    %46 = vector.shape_cast %45 : vector<1x4x32xf32> to vector<4x32xf32>
    %47 = arith.truncf %37 : vector<16x32xf32> to vector<16x32xbf16>
    %c0_25 = arith.constant 0 : index
    %c0_26 = arith.constant 0 : index
    %c0_27 = arith.constant 0 : index
    %48 = vector.load %arg6[%c0_25, %c0_26, %c0_27] : memref<2x32x96xbf16, #tpu.memory_space<vmem>>, vector<1x32x96xbf16>
    %49 = vector.shape_cast %48 : vector<1x32x96xbf16> to vector<32x96xbf16>
    %cst_28 = arith.constant dense<0.000000e+00> : vector<16x96xf32>
    %50 = tpu.matmul %47, %49, %cst_28 {dimension_numbers = #tpu.dot_dimension_numbers<[1], [0], [0], [1], [0, 0, 1, 1], [], []>} : vector<16x32xbf16>, vector<32x96xbf16>, vector<16x96xf32> -> vector<16x96xf32>
    %51 = vector.extract_strided_slice %44 {offsets = [0, 0], sizes = [1, 96], strides = [1, 1]} : vector<4x96xf32> to vector<1x96xf32>
    %52 = vector.broadcast %51 : vector<1x96xf32> to vector<16x96xf32>
    %53 = arith.addf %50, %52 : vector<16x96xf32>
    %54 = vector.extract_strided_slice %53 {offsets = [0, 0], sizes = [16, 8], strides = [1, 1]} : vector<16x96xf32> to vector<16x8xf32>
    %55 = vector.shape_cast %54 : vector<16x8xf32> to vector<2x8x8xf32>
    %56 = vector.extract_strided_slice %53 {offsets = [0, 32], sizes = [16, 8], strides = [1, 1]} : vector<16x96xf32> to vector<16x8xf32>
    %57 = vector.shape_cast %56 : vector<16x8xf32> to vector<2x8x8xf32>
    "tpu.trace_start"() <{level = 10 : i32, message = "bqd,bkd->bqk"}> : () -> ()
    %cst_29 = arith.constant dense<0.000000e+00> : vector<2x8x8xf32>
    %58 = tpu.matmul %55, %57, %cst_29 {dimension_numbers = #tpu.dot_dimension_numbers<[2], [2], [1], [1], [0, 0, 0, 1, 1, 1], [0], [0]>} : vector<2x8x8xf32>, vector<2x8x8xf32>, vector<2x8x8xf32> -> vector<2x8x8xf32>
    "tpu.trace_stop"() : () -> ()
    %59 = vector.extract_strided_slice %53 {offsets = [0, 8], sizes = [16, 8], strides = [1, 1]} : vector<16x96xf32> to vector<16x8xf32>
    %60 = vector.shape_cast %59 : vector<16x8xf32> to vector<2x8x8xf32>
    %61 = vector.extract_strided_slice %53 {offsets = [0, 40], sizes = [16, 8], strides = [1, 1]} : vector<16x96xf32> to vector<16x8xf32>
    %62 = vector.shape_cast %61 : vector<16x8xf32> to vector<2x8x8xf32>
    "tpu.trace_start"() <{level = 10 : i32, message = "bqd,bkd->bqk"}> : () -> ()
    %cst_30 = arith.constant dense<0.000000e+00> : vector<2x8x8xf32>
    %63 = tpu.matmul %60, %62, %cst_30 {dimension_numbers = #tpu.dot_dimension_numbers<[2], [2], [1], [1], [0, 0, 0, 1, 1, 1], [0], [0]>} : vector<2x8x8xf32>, vector<2x8x8xf32>, vector<2x8x8xf32> -> vector<2x8x8xf32>
    "tpu.trace_stop"() : () -> ()
    %64 = vector.extract_strided_slice %53 {offsets = [0, 16], sizes = [16, 8], strides = [1, 1]} : vector<16x96xf32> to vector<16x8xf32>
    %65 = vector.shape_cast %64 : vector<16x8xf32> to vector<2x8x8xf32>
    %66 = vector.extract_strided_slice %53 {offsets = [0, 48], sizes = [16, 8], strides = [1, 1]} : vector<16x96xf32> to vector<16x8xf32>
    %67 = vector.shape_cast %66 : vector<16x8xf32> to vector<2x8x8xf32>
    "tpu.trace_start"() <{level = 10 : i32, message = "bqd,bkd->bqk"}> : () -> ()
    %cst_31 = arith.constant dense<0.000000e+00> : vector<2x8x8xf32>
    %68 = tpu.matmul %65, %67, %cst_31 {dimension_numbers = #tpu.dot_dimension_numbers<[2], [2], [1], [1], [0, 0, 0, 1, 1, 1], [0], [0]>} : vector<2x8x8xf32>, vector<2x8x8xf32>, vector<2x8x8xf32> -> vector<2x8x8xf32>
    "tpu.trace_stop"() : () -> ()
    %69 = vector.extract_strided_slice %53 {offsets = [0, 24], sizes = [16, 8], strides = [1, 1]} : vector<16x96xf32> to vector<16x8xf32>
    %70 = vector.shape_cast %69 : vector<16x8xf32> to vector<2x8x8xf32>
    %71 = vector.extract_strided_slice %53 {offsets = [0, 56], sizes = [16, 8], strides = [1, 1]} : vector<16x96xf32> to vector<16x8xf32>
    %72 = vector.shape_cast %71 : vector<16x8xf32> to vector<2x8x8xf32>
    "tpu.trace_start"() <{level = 10 : i32, message = "bqd,bkd->bqk"}> : () -> ()
    %cst_32 = arith.constant dense<0.000000e+00> : vector<2x8x8xf32>
    %73 = tpu.matmul %70, %72, %cst_32 {dimension_numbers = #tpu.dot_dimension_numbers<[2], [2], [1], [1], [0, 0, 0, 1, 1, 1], [0], [0]>} : vector<2x8x8xf32>, vector<2x8x8xf32>, vector<2x8x8xf32> -> vector<2x8x8xf32>
    "tpu.trace_stop"() : () -> ()
    %74 = tpu.concatenate %58, %63, %68, %73 in 1 : vector<2x8x8xf32>, vector<2x8x8xf32>, vector<2x8x8xf32>, vector<2x8x8xf32> -> vector<2x32x8xf32>
    %75 = vector.broadcast %42 : vector<2x1x8xf32> to vector<2x32x8xf32>
    %76 = arith.addf %74, %75 : vector<2x32x8xf32>
    %cst_33 = arith.constant dense<0xFF800000> : vector<2x32xf32>
    %77 = vector.multi_reduction <maximumf>, %76, %cst_33 [2] : vector<2x32x8xf32> to vector<2x32xf32>
    %78 = vector.shape_cast %77 : vector<2x32xf32> to vector<2x32x1xf32>
    %79 = vector.broadcast %78 : vector<2x32x1xf32> to vector<2x32x8xf32>
    %80 = arith.subf %76, %79 : vector<2x32x8xf32>
    %81 = math.exp %80 : vector<2x32x8xf32>
    %cst_34 = arith.constant dense<0.000000e+00> : vector<2x32xf32>
    %82 = vector.multi_reduction <add>, %81, %cst_34 [2] : vector<2x32x8xf32> to vector<2x32xf32>
    %83 = vector.shape_cast %82 : vector<2x32xf32> to vector<2x32x1xf32>
    %84 = tpu.reciprocal %83 : vector<2x32x1xf32> -> vector<2x32x1xf32>
    %85 = vector.broadcast %84 : vector<2x32x1xf32> to vector<2x32x8xf32>
    %86 = arith.mulf %81, %85 : vector<2x32x8xf32>
    %87 = vector.extract_strided_slice %53 {offsets = [0, 64], sizes = [16, 8], strides = [1, 1]} : vector<16x96xf32> to vector<16x8xf32>
    %88 = vector.shape_cast %87 : vector<16x8xf32> to vector<2x8x8xf32>
    %89 = vector.extract_strided_slice %86 {offsets = [0, 0, 0], sizes = [2, 8, 8], strides = [1, 1, 1]} : vector<2x32x8xf32> to vector<2x8x8xf32>
    %90 = arith.truncf %89 : vector<2x8x8xf32> to vector<2x8x8xbf16>
    %91 = arith.truncf %88 : vector<2x8x8xf32> to vector<2x8x8xbf16>
    "tpu.trace_start"() <{level = 10 : i32, message = "bqk,bkd->bqd"}> : () -> ()
    %cst_35 = arith.constant dense<0.000000e+00> : vector<2x8x8xf32>
    %92 = tpu.matmul %90, %91, %cst_35 {dimension_numbers = #tpu.dot_dimension_numbers<[2], [1], [1], [2], [0, 0, 0, 1, 1, 2], [0], [0]>} : vector<2x8x8xbf16>, vector<2x8x8xbf16>, vector<2x8x8xf32> -> vector<2x8x8xf32>
    "tpu.trace_stop"() : () -> ()
    %93 = vector.shape_cast %92 : vector<2x8x8xf32> to vector<16x8xf32>
    %94 = vector.extract_strided_slice %53 {offsets = [0, 72], sizes = [16, 8], strides = [1, 1]} : vector<16x96xf32> to vector<16x8xf32>
    %95 = vector.shape_cast %94 : vector<16x8xf32> to vector<2x8x8xf32>
    %96 = vector.extract_strided_slice %86 {offsets = [0, 8, 0], sizes = [2, 8, 8], strides = [1, 1, 1]} : vector<2x32x8xf32> to vector<2x8x8xf32>
    %97 = arith.truncf %96 : vector<2x8x8xf32> to vector<2x8x8xbf16>
    %98 = arith.truncf %95 : vector<2x8x8xf32> to vector<2x8x8xbf16>
    "tpu.trace_start"() <{level = 10 : i32, message = "bqk,bkd->bqd"}> : () -> ()
    %cst_36 = arith.constant dense<0.000000e+00> : vector<2x8x8xf32>
    %99 = tpu.matmul %97, %98, %cst_36 {dimension_numbers = #tpu.dot_dimension_numbers<[2], [1], [1], [2], [0, 0, 0, 1, 1, 2], [0], [0]>} : vector<2x8x8xbf16>, vector<2x8x8xbf16>, vector<2x8x8xf32> -> vector<2x8x8xf32>
    "tpu.trace_stop"() : () -> ()
    %100 = vector.shape_cast %99 : vector<2x8x8xf32> to vector<16x8xf32>
    %101 = vector.extract_strided_slice %53 {offsets = [0, 80], sizes = [16, 8], strides = [1, 1]} : vector<16x96xf32> to vector<16x8xf32>
    %102 = vector.shape_cast %101 : vector<16x8xf32> to vector<2x8x8xf32>
    %103 = vector.extract_strided_slice %86 {offsets = [0, 16, 0], sizes = [2, 8, 8], strides = [1, 1, 1]} : vector<2x32x8xf32> to vector<2x8x8xf32>
    %104 = arith.truncf %103 : vector<2x8x8xf32> to vector<2x8x8xbf16>
    %105 = arith.truncf %102 : vector<2x8x8xf32> to vector<2x8x8xbf16>
    "tpu.trace_start"() <{level = 10 : i32, message = "bqk,bkd->bqd"}> : () -> ()
    %cst_37 = arith.constant dense<0.000000e+00> : vector<2x8x8xf32>
    %106 = tpu.matmul %104, %105, %cst_37 {dimension_numbers = #tpu.dot_dimension_numbers<[2], [1], [1], [2], [0, 0, 0, 1, 1, 2], [0], [0]>} : vector<2x8x8xbf16>, vector<2x8x8xbf16>, vector<2x8x8xf32> -> vector<2x8x8xf32>
    "tpu.trace_stop"() : () -> ()
    %107 = vector.shape_cast %106 : vector<2x8x8xf32> to vector<16x8xf32>
    %108 = vector.extract_strided_slice %53 {offsets = [0, 88], sizes = [16, 8], strides = [1, 1]} : vector<16x96xf32> to vector<16x8xf32>
    %109 = vector.shape_cast %108 : vector<16x8xf32> to vector<2x8x8xf32>
    %110 = vector.extract_strided_slice %86 {offsets = [0, 24, 0], sizes = [2, 8, 8], strides = [1, 1, 1]} : vector<2x32x8xf32> to vector<2x8x8xf32>
    %111 = arith.truncf %110 : vector<2x8x8xf32> to vector<2x8x8xbf16>
    %112 = arith.truncf %109 : vector<2x8x8xf32> to vector<2x8x8xbf16>
    "tpu.trace_start"() <{level = 10 : i32, message = "bqk,bkd->bqd"}> : () -> ()
    %cst_38 = arith.constant dense<0.000000e+00> : vector<2x8x8xf32>
    %113 = tpu.matmul %111, %112, %cst_38 {dimension_numbers = #tpu.dot_dimension_numbers<[2], [1], [1], [2], [0, 0, 0, 1, 1, 2], [0], [0]>} : vector<2x8x8xbf16>, vector<2x8x8xbf16>, vector<2x8x8xf32> -> vector<2x8x8xf32>
    "tpu.trace_stop"() : () -> ()
    %114 = vector.shape_cast %113 : vector<2x8x8xf32> to vector<16x8xf32>
    %115 = tpu.concatenate %93, %100, %107, %114 in 1 : vector<16x8xf32>, vector<16x8xf32>, vector<16x8xf32>, vector<16x8xf32> -> vector<16x32xf32>
    %116 = arith.truncf %115 : vector<16x32xf32> to vector<16x32xbf16>
    %c0_39 = arith.constant 0 : index
    %c0_40 = arith.constant 0 : index
    %c0_41 = arith.constant 0 : index
    %117 = vector.load %arg7[%c0_39, %c0_40, %c0_41] : memref<2x32x32xbf16, #tpu.memory_space<vmem>>, vector<1x32x32xbf16>
    %118 = vector.shape_cast %117 : vector<1x32x32xbf16> to vector<32x32xbf16>
    %cst_42 = arith.constant dense<0.000000e+00> : vector<16x32xf32>
    %119 = tpu.matmul %116, %118, %cst_42 {dimension_numbers = #tpu.dot_dimension_numbers<[1], [0], [0], [1], [0, 0, 1, 1], [], []>} : vector<16x32xbf16>, vector<32x32xbf16>, vector<16x32xf32> -> vector<16x32xf32>
    %120 = vector.extract_strided_slice %44 {offsets = [1, 0], sizes = [1, 32], strides = [1, 1]} : vector<4x96xf32> to vector<1x32xf32>
    %121 = vector.broadcast %120 : vector<1x32xf32> to vector<16x32xf32>
    %122 = arith.addf %119, %121 : vector<16x32xf32>
    %123 = arith.addf %37, %122 : vector<16x32xf32>
    %124 = vector.extract_strided_slice %46 {offsets = [0, 0], sizes = [1, 32], strides = [1, 1]} : vector<4x32xf32> to vector<1x32xf32>
    %125 = vector.extract_strided_slice %46 {offsets = [1, 0], sizes = [1, 32], strides = [1, 1]} : vector<4x32xf32> to vector<1x32xf32>
    %cst_43 = arith.constant dense<0.000000e+00> : vector<16xf32>
    %126 = vector.multi_reduction <add>, %123, %cst_43 [1] : vector<16x32xf32> to vector<16xf32>
    %127 = vector.shape_cast %126 : vector<16xf32> to vector<16x1xf32>
    %cst_44 = arith.constant 3.200000e+01 : f32
    %128 = vector.broadcast %cst_44 : f32 to vector<16x1xf32>
    %129 = arith.divf %127, %128 : vector<16x1xf32>
    %130 = vector.broadcast %129 : vector<16x1xf32> to vector<16x32xf32>
    %131 = arith.subf %123, %130 : vector<16x32xf32>
    %132 = arith.mulf %131, %131 : vector<16x32xf32>
    %cst_45 = arith.constant dense<0.000000e+00> : vector<16xf32>
    %133 = vector.multi_reduction <add>, %132, %cst_45 [1] : vector<16x32xf32> to vector<16xf32>
    %134 = vector.shape_cast %133 : vector<16xf32> to vector<16x1xf32>
    %cst_46 = arith.constant 3.200000e+01 : f32
    %135 = vector.broadcast %cst_46 : f32 to vector<16x1xf32>
    %136 = arith.divf %134, %135 : vector<16x1xf32>
    %137 = vector.broadcast %129 : vector<16x1xf32> to vector<16x32xf32>
    %138 = arith.subf %123, %137 : vector<16x32xf32>
    %cst_47 = arith.constant 9.99999974E-6 : f32
    %139 = vector.broadcast %cst_47 : f32 to vector<16x1xf32>
    %140 = arith.addf %136, %139 : vector<16x1xf32>
    %141 = math.rsqrt %140 : vector<16x1xf32>
    %142 = vector.broadcast %141 : vector<16x1xf32> to vector<16x32xf32>
    %143 = arith.mulf %138, %142 : vector<16x32xf32>
    %144 = vector.broadcast %124 : vector<1x32xf32> to vector<16x32xf32>
    %145 = arith.mulf %143, %144 : vector<16x32xf32>
    %146 = vector.broadcast %125 : vector<1x32xf32> to vector<16x32xf32>
    %147 = arith.addf %145, %146 : vector<16x32xf32>
    %148 = arith.truncf %147 : vector<16x32xf32> to vector<16x32xbf16>
    %c0_48 = arith.constant 0 : index
    %c0_49 = arith.constant 0 : index
    %c0_50 = arith.constant 0 : index
    %149 = vector.load %arg8[%c0_48, %c0_49, %c0_50] : memref<2x32x64xbf16, #tpu.memory_space<vmem>>, vector<1x32x64xbf16>
    %150 = vector.shape_cast %149 : vector<1x32x64xbf16> to vector<32x64xbf16>
    %cst_51 = arith.constant dense<0.000000e+00> : vector<16x64xf32>
    %151 = tpu.matmul %148, %150, %cst_51 {dimension_numbers = #tpu.dot_dimension_numbers<[1], [0], [0], [1], [0, 0, 1, 1], [], []>} : vector<16x32xbf16>, vector<32x64xbf16>, vector<16x64xf32> -> vector<16x64xf32>
    %152 = vector.extract_strided_slice %44 {offsets = [2, 0], sizes = [1, 64], strides = [1, 1]} : vector<4x96xf32> to vector<1x64xf32>
    %153 = vector.broadcast %152 : vector<1x64xf32> to vector<16x64xf32>
    %154 = arith.addf %151, %153 : vector<16x64xf32>
    %cst_52 = arith.constant 5.000000e-01 : f32
    %155 = vector.broadcast %cst_52 : f32 to vector<16x64xf32>
    %156 = arith.mulf %155, %154 : vector<16x64xf32>
    %cst_53 = arith.constant 4.471500e-02 : f32
    %157 = vector.broadcast %cst_53 : f32 to vector<16x64xf32>
    %158 = arith.mulf %157, %154 : vector<16x64xf32>
    %159 = arith.mulf %158, %154 : vector<16x64xf32>
    %160 = arith.mulf %159, %154 : vector<16x64xf32>
    %161 = arith.addf %154, %160 : vector<16x64xf32>
    %cst_54 = arith.constant 0.797884583 : f32
    %162 = vector.broadcast %cst_54 : f32 to vector<16x64xf32>
    %163 = arith.mulf %162, %161 : vector<16x64xf32>
    %164 = math.tanh %163 : vector<16x64xf32>
    %cst_55 = arith.constant 1.000000e+00 : f32
    %165 = vector.broadcast %cst_55 : f32 to vector<16x64xf32>
    %166 = arith.addf %165, %164 : vector<16x64xf32>
    %167 = arith.mulf %156, %166 : vector<16x64xf32>
    %168 = arith.truncf %167 : vector<16x64xf32> to vector<16x64xbf16>
    %c0_56 = arith.constant 0 : index
    %c0_57 = arith.constant 0 : index
    %c0_58 = arith.constant 0 : index
    %169 = vector.load %arg9[%c0_56, %c0_57, %c0_58] : memref<2x64x32xbf16, #tpu.memory_space<vmem>>, vector<1x64x32xbf16>
    %170 = vector.shape_cast %169 : vector<1x64x32xbf16> to vector<64x32xbf16>
    %cst_59 = arith.constant dense<0.000000e+00> : vector<16x32xf32>
    %171 = tpu.matmul %168, %170, %cst_59 {dimension_numbers = #tpu.dot_dimension_numbers<[1], [0], [0], [1], [0, 0, 1, 1], [], []>} : vector<16x64xbf16>, vector<64x32xbf16>, vector<16x32xf32> -> vector<16x32xf32>
    %172 = vector.extract_strided_slice %44 {offsets = [3, 0], sizes = [1, 32], strides = [1, 1]} : vector<4x96xf32> to vector<1x32xf32>
    %173 = vector.broadcast %172 : vector<1x32xf32> to vector<16x32xf32>
    %174 = arith.addf %171, %173 : vector<16x32xf32>
    %175 = arith.addf %147, %174 : vector<16x32xf32>
    %176 = vector.extract_strided_slice %46 {offsets = [2, 0], sizes = [1, 32], strides = [1, 1]} : vector<4x32xf32> to vector<1x32xf32>
    %177 = vector.extract_strided_slice %46 {offsets = [3, 0], sizes = [1, 32], strides = [1, 1]} : vector<4x32xf32> to vector<1x32xf32>
    %cst_60 = arith.constant dense<0.000000e+00> : vector<16xf32>
    %178 = vector.multi_reduction <add>, %175, %cst_60 [1] : vector<16x32xf32> to vector<16xf32>
    %179 = vector.shape_cast %178 : vector<16xf32> to vector<16x1xf32>
    %cst_61 = arith.constant 3.200000e+01 : f32
    %180 = vector.broadcast %cst_61 : f32 to vector<16x1xf32>
    %181 = arith.divf %179, %180 : vector<16x1xf32>
    %182 = vector.broadcast %181 : vector<16x1xf32> to vector<16x32xf32>
    %183 = arith.subf %175, %182 : vector<16x32xf32>
    %184 = arith.mulf %183, %183 : vector<16x32xf32>
    %cst_62 = arith.constant dense<0.000000e+00> : vector<16xf32>
    %185 = vector.multi_reduction <add>, %184, %cst_62 [1] : vector<16x32xf32> to vector<16xf32>
    %186 = vector.shape_cast %185 : vector<16xf32> to vector<16x1xf32>
    %cst_63 = arith.constant 3.200000e+01 : f32
    %187 = vector.broadcast %cst_63 : f32 to vector<16x1xf32>
    %188 = arith.divf %186, %187 : vector<16x1xf32>
    %189 = vector.broadcast %181 : vector<16x1xf32> to vector<16x32xf32>
    %190 = arith.subf %175, %189 : vector<16x32xf32>
    %cst_64 = arith.constant 9.99999974E-6 : f32
    %191 = vector.broadcast %cst_64 : f32 to vector<16x1xf32>
    %192 = arith.addf %188, %191 : vector<16x1xf32>
    %193 = math.rsqrt %192 : vector<16x1xf32>
    %194 = vector.broadcast %193 : vector<16x1xf32> to vector<16x32xf32>
    %195 = arith.mulf %190, %194 : vector<16x32xf32>
    %196 = vector.broadcast %176 : vector<1x32xf32> to vector<16x32xf32>
    %197 = arith.mulf %195, %196 : vector<16x32xf32>
    %198 = vector.broadcast %177 : vector<1x32xf32> to vector<16x32xf32>
    %199 = arith.addf %197, %198 : vector<16x32xf32>
    %c1_65 = arith.constant 1 : index
    %c0_66 = arith.constant 0 : index
    %c0_67 = arith.constant 0 : index
    %200 = vector.load %arg10[%c1_65, %c0_66, %c0_67] : memref<2x4x96xf32, #tpu.memory_space<vmem>>, vector<1x4x96xf32>
    %201 = vector.shape_cast %200 : vector<1x4x96xf32> to vector<4x96xf32>
    %c1_68 = arith.constant 1 : index
    %c0_69 = arith.constant 0 : index
    %c0_70 = arith.constant 0 : index
    %202 = vector.load %arg11[%c1_68, %c0_69, %c0_70] : memref<2x4x32xf32, #tpu.memory_space<vmem>>, vector<1x4x32xf32>
    %203 = vector.shape_cast %202 : vector<1x4x32xf32> to vector<4x32xf32>
    %204 = arith.truncf %199 : vector<16x32xf32> to vector<16x32xbf16>
    %c1_71 = arith.constant 1 : index
    %c0_72 = arith.constant 0 : index
    %c0_73 = arith.constant 0 : index
    %205 = vector.load %arg6[%c1_71, %c0_72, %c0_73] : memref<2x32x96xbf16, #tpu.memory_space<vmem>>, vector<1x32x96xbf16>
    %206 = vector.shape_cast %205 : vector<1x32x96xbf16> to vector<32x96xbf16>
    %cst_74 = arith.constant dense<0.000000e+00> : vector<16x96xf32>
    %207 = tpu.matmul %204, %206, %cst_74 {dimension_numbers = #tpu.dot_dimension_numbers<[1], [0], [0], [1], [0, 0, 1, 1], [], []>} : vector<16x32xbf16>, vector<32x96xbf16>, vector<16x96xf32> -> vector<16x96xf32>
    %208 = vector.extract_strided_slice %201 {offsets = [0, 0], sizes = [1, 96], strides = [1, 1]} : vector<4x96xf32> to vector<1x96xf32>
    %209 = vector.broadcast %208 : vector<1x96xf32> to vector<16x96xf32>
    %210 = arith.addf %207, %209 : vector<16x96xf32>
    %211 = vector.extract_strided_slice %210 {offsets = [0, 0], sizes = [16, 8], strides = [1, 1]} : vector<16x96xf32> to vector<16x8xf32>
    %212 = vector.shape_cast %211 : vector<16x8xf32> to vector<2x8x8xf32>
    %213 = vector.extract_strided_slice %210 {offsets = [0, 32], sizes = [16, 8], strides = [1, 1]} : vector<16x96xf32> to vector<16x8xf32>
    %214 = vector.shape_cast %213 : vector<16x8xf32> to vector<2x8x8xf32>
    "tpu.trace_start"() <{level = 10 : i32, message = "bqd,bkd->bqk"}> : () -> ()
    %cst_75 = arith.constant dense<0.000000e+00> : vector<2x8x8xf32>
    %215 = tpu.matmul %212, %214, %cst_75 {dimension_numbers = #tpu.dot_dimension_numbers<[2], [2], [1], [1], [0, 0, 0, 1, 1, 1], [0], [0]>} : vector<2x8x8xf32>, vector<2x8x8xf32>, vector<2x8x8xf32> -> vector<2x8x8xf32>
    "tpu.trace_stop"() : () -> ()
    %216 = vector.extract_strided_slice %210 {offsets = [0, 8], sizes = [16, 8], strides = [1, 1]} : vector<16x96xf32> to vector<16x8xf32>
    %217 = vector.shape_cast %216 : vector<16x8xf32> to vector<2x8x8xf32>
    %218 = vector.extract_strided_slice %210 {offsets = [0, 40], sizes = [16, 8], strides = [1, 1]} : vector<16x96xf32> to vector<16x8xf32>
    %219 = vector.shape_cast %218 : vector<16x8xf32> to vector<2x8x8xf32>
    "tpu.trace_start"() <{level = 10 : i32, message = "bqd,bkd->bqk"}> : () -> ()
    %cst_76 = arith.constant dense<0.000000e+00> : vector<2x8x8xf32>
    %220 = tpu.matmul %217, %219, %cst_76 {dimension_numbers = #tpu.dot_dimension_numbers<[2], [2], [1], [1], [0, 0, 0, 1, 1, 1], [0], [0]>} : vector<2x8x8xf32>, vector<2x8x8xf32>, vector<2x8x8xf32> -> vector<2x8x8xf32>
    "tpu.trace_stop"() : () -> ()
    %221 = vector.extract_strided_slice %210 {offsets = [0, 16], sizes = [16, 8], strides = [1, 1]} : vector<16x96xf32> to vector<16x8xf32>
    %222 = vector.shape_cast %221 : vector<16x8xf32> to vector<2x8x8xf32>
    %223 = vector.extract_strided_slice %210 {offsets = [0, 48], sizes = [16, 8], strides = [1, 1]} : vector<16x96xf32> to vector<16x8xf32>
    %224 = vector.shape_cast %223 : vector<16x8xf32> to vector<2x8x8xf32>
    "tpu.trace_start"() <{level = 10 : i32, message = "bqd,bkd->bqk"}> : () -> ()
    %cst_77 = arith.constant dense<0.000000e+00> : vector<2x8x8xf32>
    %225 = tpu.matmul %222, %224, %cst_77 {dimension_numbers = #tpu.dot_dimension_numbers<[2], [2], [1], [1], [0, 0, 0, 1, 1, 1], [0], [0]>} : vector<2x8x8xf32>, vector<2x8x8xf32>, vector<2x8x8xf32> -> vector<2x8x8xf32>
    "tpu.trace_stop"() : () -> ()
    %226 = vector.extract_strided_slice %210 {offsets = [0, 24], sizes = [16, 8], strides = [1, 1]} : vector<16x96xf32> to vector<16x8xf32>
    %227 = vector.shape_cast %226 : vector<16x8xf32> to vector<2x8x8xf32>
    %228 = vector.extract_strided_slice %210 {offsets = [0, 56], sizes = [16, 8], strides = [1, 1]} : vector<16x96xf32> to vector<16x8xf32>
    %229 = vector.shape_cast %228 : vector<16x8xf32> to vector<2x8x8xf32>
    "tpu.trace_start"() <{level = 10 : i32, message = "bqd,bkd->bqk"}> : () -> ()
    %cst_78 = arith.constant dense<0.000000e+00> : vector<2x8x8xf32>
    %230 = tpu.matmul %227, %229, %cst_78 {dimension_numbers = #tpu.dot_dimension_numbers<[2], [2], [1], [1], [0, 0, 0, 1, 1, 1], [0], [0]>} : vector<2x8x8xf32>, vector<2x8x8xf32>, vector<2x8x8xf32> -> vector<2x8x8xf32>
    "tpu.trace_stop"() : () -> ()
    %231 = tpu.concatenate %215, %220, %225, %230 in 1 : vector<2x8x8xf32>, vector<2x8x8xf32>, vector<2x8x8xf32>, vector<2x8x8xf32> -> vector<2x32x8xf32>
    %232 = vector.broadcast %42 : vector<2x1x8xf32> to vector<2x32x8xf32>
    %233 = arith.addf %231, %232 : vector<2x32x8xf32>
    %cst_79 = arith.constant dense<0xFF800000> : vector<2x32xf32>
    %234 = vector.multi_reduction <maximumf>, %233, %cst_79 [2] : vector<2x32x8xf32> to vector<2x32xf32>
    %235 = vector.shape_cast %234 : vector<2x32xf32> to vector<2x32x1xf32>
    %236 = vector.broadcast %235 : vector<2x32x1xf32> to vector<2x32x8xf32>
    %237 = arith.subf %233, %236 : vector<2x32x8xf32>
    %238 = math.exp %237 : vector<2x32x8xf32>
    %cst_80 = arith.constant dense<0.000000e+00> : vector<2x32xf32>
    %239 = vector.multi_reduction <add>, %238, %cst_80 [2] : vector<2x32x8xf32> to vector<2x32xf32>
    %240 = vector.shape_cast %239 : vector<2x32xf32> to vector<2x32x1xf32>
    %241 = tpu.reciprocal %240 : vector<2x32x1xf32> -> vector<2x32x1xf32>
    %242 = vector.broadcast %241 : vector<2x32x1xf32> to vector<2x32x8xf32>
    %243 = arith.mulf %238, %242 : vector<2x32x8xf32>
    %244 = vector.extract_strided_slice %210 {offsets = [0, 64], sizes = [16, 8], strides = [1, 1]} : vector<16x96xf32> to vector<16x8xf32>
    %245 = vector.shape_cast %244 : vector<16x8xf32> to vector<2x8x8xf32>
    %246 = vector.extract_strided_slice %243 {offsets = [0, 0, 0], sizes = [2, 8, 8], strides = [1, 1, 1]} : vector<2x32x8xf32> to vector<2x8x8xf32>
    %247 = arith.truncf %246 : vector<2x8x8xf32> to vector<2x8x8xbf16>
    %248 = arith.truncf %245 : vector<2x8x8xf32> to vector<2x8x8xbf16>
    "tpu.trace_start"() <{level = 10 : i32, message = "bqk,bkd->bqd"}> : () -> ()
    %cst_81 = arith.constant dense<0.000000e+00> : vector<2x8x8xf32>
    %249 = tpu.matmul %247, %248, %cst_81 {dimension_numbers = #tpu.dot_dimension_numbers<[2], [1], [1], [2], [0, 0, 0, 1, 1, 2], [0], [0]>} : vector<2x8x8xbf16>, vector<2x8x8xbf16>, vector<2x8x8xf32> -> vector<2x8x8xf32>
    "tpu.trace_stop"() : () -> ()
    %250 = vector.shape_cast %249 : vector<2x8x8xf32> to vector<16x8xf32>
    %251 = vector.extract_strided_slice %210 {offsets = [0, 72], sizes = [16, 8], strides = [1, 1]} : vector<16x96xf32> to vector<16x8xf32>
    %252 = vector.shape_cast %251 : vector<16x8xf32> to vector<2x8x8xf32>
    %253 = vector.extract_strided_slice %243 {offsets = [0, 8, 0], sizes = [2, 8, 8], strides = [1, 1, 1]} : vector<2x32x8xf32> to vector<2x8x8xf32>
    %254 = arith.truncf %253 : vector<2x8x8xf32> to vector<2x8x8xbf16>
    %255 = arith.truncf %252 : vector<2x8x8xf32> to vector<2x8x8xbf16>
    "tpu.trace_start"() <{level = 10 : i32, message = "bqk,bkd->bqd"}> : () -> ()
    %cst_82 = arith.constant dense<0.000000e+00> : vector<2x8x8xf32>
    %256 = tpu.matmul %254, %255, %cst_82 {dimension_numbers = #tpu.dot_dimension_numbers<[2], [1], [1], [2], [0, 0, 0, 1, 1, 2], [0], [0]>} : vector<2x8x8xbf16>, vector<2x8x8xbf16>, vector<2x8x8xf32> -> vector<2x8x8xf32>
    "tpu.trace_stop"() : () -> ()
    %257 = vector.shape_cast %256 : vector<2x8x8xf32> to vector<16x8xf32>
    %258 = vector.extract_strided_slice %210 {offsets = [0, 80], sizes = [16, 8], strides = [1, 1]} : vector<16x96xf32> to vector<16x8xf32>
    %259 = vector.shape_cast %258 : vector<16x8xf32> to vector<2x8x8xf32>
    %260 = vector.extract_strided_slice %243 {offsets = [0, 16, 0], sizes = [2, 8, 8], strides = [1, 1, 1]} : vector<2x32x8xf32> to vector<2x8x8xf32>
    %261 = arith.truncf %260 : vector<2x8x8xf32> to vector<2x8x8xbf16>
    %262 = arith.truncf %259 : vector<2x8x8xf32> to vector<2x8x8xbf16>
    "tpu.trace_start"() <{level = 10 : i32, message = "bqk,bkd->bqd"}> : () -> ()
    %cst_83 = arith.constant dense<0.000000e+00> : vector<2x8x8xf32>
    %263 = tpu.matmul %261, %262, %cst_83 {dimension_numbers = #tpu.dot_dimension_numbers<[2], [1], [1], [2], [0, 0, 0, 1, 1, 2], [0], [0]>} : vector<2x8x8xbf16>, vector<2x8x8xbf16>, vector<2x8x8xf32> -> vector<2x8x8xf32>
    "tpu.trace_stop"() : () -> ()
    %264 = vector.shape_cast %263 : vector<2x8x8xf32> to vector<16x8xf32>
    %265 = vector.extract_strided_slice %210 {offsets = [0, 88], sizes = [16, 8], strides = [1, 1]} : vector<16x96xf32> to vector<16x8xf32>
    %266 = vector.shape_cast %265 : vector<16x8xf32> to vector<2x8x8xf32>
    %267 = vector.extract_strided_slice %243 {offsets = [0, 24, 0], sizes = [2, 8, 8], strides = [1, 1, 1]} : vector<2x32x8xf32> to vector<2x8x8xf32>
    %268 = arith.truncf %267 : vector<2x8x8xf32> to vector<2x8x8xbf16>
    %269 = arith.truncf %266 : vector<2x8x8xf32> to vector<2x8x8xbf16>
    "tpu.trace_start"() <{level = 10 : i32, message = "bqk,bkd->bqd"}> : () -> ()
    %cst_84 = arith.constant dense<0.000000e+00> : vector<2x8x8xf32>
    %270 = tpu.matmul %268, %269, %cst_84 {dimension_numbers = #tpu.dot_dimension_numbers<[2], [1], [1], [2], [0, 0, 0, 1, 1, 2], [0], [0]>} : vector<2x8x8xbf16>, vector<2x8x8xbf16>, vector<2x8x8xf32> -> vector<2x8x8xf32>
    "tpu.trace_stop"() : () -> ()
    %271 = vector.shape_cast %270 : vector<2x8x8xf32> to vector<16x8xf32>
    %272 = tpu.concatenate %250, %257, %264, %271 in 1 : vector<16x8xf32>, vector<16x8xf32>, vector<16x8xf32>, vector<16x8xf32> -> vector<16x32xf32>
    %273 = arith.truncf %272 : vector<16x32xf32> to vector<16x32xbf16>
    %c1_85 = arith.constant 1 : index
    %c0_86 = arith.constant 0 : index
    %c0_87 = arith.constant 0 : index
    %274 = vector.load %arg7[%c1_85, %c0_86, %c0_87] : memref<2x32x32xbf16, #tpu.memory_space<vmem>>, vector<1x32x32xbf16>
    %275 = vector.shape_cast %274 : vector<1x32x32xbf16> to vector<32x32xbf16>
    %cst_88 = arith.constant dense<0.000000e+00> : vector<16x32xf32>
    %276 = tpu.matmul %273, %275, %cst_88 {dimension_numbers = #tpu.dot_dimension_numbers<[1], [0], [0], [1], [0, 0, 1, 1], [], []>} : vector<16x32xbf16>, vector<32x32xbf16>, vector<16x32xf32> -> vector<16x32xf32>
    %277 = vector.extract_strided_slice %201 {offsets = [1, 0], sizes = [1, 32], strides = [1, 1]} : vector<4x96xf32> to vector<1x32xf32>
    %278 = vector.broadcast %277 : vector<1x32xf32> to vector<16x32xf32>
    %279 = arith.addf %276, %278 : vector<16x32xf32>
    %280 = arith.addf %199, %279 : vector<16x32xf32>
    %281 = vector.extract_strided_slice %203 {offsets = [0, 0], sizes = [1, 32], strides = [1, 1]} : vector<4x32xf32> to vector<1x32xf32>
    %282 = vector.extract_strided_slice %203 {offsets = [1, 0], sizes = [1, 32], strides = [1, 1]} : vector<4x32xf32> to vector<1x32xf32>
    %cst_89 = arith.constant dense<0.000000e+00> : vector<16xf32>
    %283 = vector.multi_reduction <add>, %280, %cst_89 [1] : vector<16x32xf32> to vector<16xf32>
    %284 = vector.shape_cast %283 : vector<16xf32> to vector<16x1xf32>
    %cst_90 = arith.constant 3.200000e+01 : f32
    %285 = vector.broadcast %cst_90 : f32 to vector<16x1xf32>
    %286 = arith.divf %284, %285 : vector<16x1xf32>
    %287 = vector.broadcast %286 : vector<16x1xf32> to vector<16x32xf32>
    %288 = arith.subf %280, %287 : vector<16x32xf32>
    %289 = arith.mulf %288, %288 : vector<16x32xf32>
    %cst_91 = arith.constant dense<0.000000e+00> : vector<16xf32>
    %290 = vector.multi_reduction <add>, %289, %cst_91 [1] : vector<16x32xf32> to vector<16xf32>
    %291 = vector.shape_cast %290 : vector<16xf32> to vector<16x1xf32>
    %cst_92 = arith.constant 3.200000e+01 : f32
    %292 = vector.broadcast %cst_92 : f32 to vector<16x1xf32>
    %293 = arith.divf %291, %292 : vector<16x1xf32>
    %294 = vector.broadcast %286 : vector<16x1xf32> to vector<16x32xf32>
    %295 = arith.subf %280, %294 : vector<16x32xf32>
    %cst_93 = arith.constant 9.99999974E-6 : f32
    %296 = vector.broadcast %cst_93 : f32 to vector<16x1xf32>
    %297 = arith.addf %293, %296 : vector<16x1xf32>
    %298 = math.rsqrt %297 : vector<16x1xf32>
    %299 = vector.broadcast %298 : vector<16x1xf32> to vector<16x32xf32>
    %300 = arith.mulf %295, %299 : vector<16x32xf32>
    %301 = vector.broadcast %281 : vector<1x32xf32> to vector<16x32xf32>
    %302 = arith.mulf %300, %301 : vector<16x32xf32>
    %303 = vector.broadcast %282 : vector<1x32xf32> to vector<16x32xf32>
    %304 = arith.addf %302, %303 : vector<16x32xf32>
    %305 = arith.truncf %304 : vector<16x32xf32> to vector<16x32xbf16>
    %c1_94 = arith.constant 1 : index
    %c0_95 = arith.constant 0 : index
    %c0_96 = arith.constant 0 : index
    %306 = vector.load %arg8[%c1_94, %c0_95, %c0_96] : memref<2x32x64xbf16, #tpu.memory_space<vmem>>, vector<1x32x64xbf16>
    %307 = vector.shape_cast %306 : vector<1x32x64xbf16> to vector<32x64xbf16>
    %cst_97 = arith.constant dense<0.000000e+00> : vector<16x64xf32>
    %308 = tpu.matmul %305, %307, %cst_97 {dimension_numbers = #tpu.dot_dimension_numbers<[1], [0], [0], [1], [0, 0, 1, 1], [], []>} : vector<16x32xbf16>, vector<32x64xbf16>, vector<16x64xf32> -> vector<16x64xf32>
    %309 = vector.extract_strided_slice %201 {offsets = [2, 0], sizes = [1, 64], strides = [1, 1]} : vector<4x96xf32> to vector<1x64xf32>
    %310 = vector.broadcast %309 : vector<1x64xf32> to vector<16x64xf32>
    %311 = arith.addf %308, %310 : vector<16x64xf32>
    %cst_98 = arith.constant 5.000000e-01 : f32
    %312 = vector.broadcast %cst_98 : f32 to vector<16x64xf32>
    %313 = arith.mulf %312, %311 : vector<16x64xf32>
    %cst_99 = arith.constant 4.471500e-02 : f32
    %314 = vector.broadcast %cst_99 : f32 to vector<16x64xf32>
    %315 = arith.mulf %314, %311 : vector<16x64xf32>
    %316 = arith.mulf %315, %311 : vector<16x64xf32>
    %317 = arith.mulf %316, %311 : vector<16x64xf32>
    %318 = arith.addf %311, %317 : vector<16x64xf32>
    %cst_100 = arith.constant 0.797884583 : f32
    %319 = vector.broadcast %cst_100 : f32 to vector<16x64xf32>
    %320 = arith.mulf %319, %318 : vector<16x64xf32>
    %321 = math.tanh %320 : vector<16x64xf32>
    %cst_101 = arith.constant 1.000000e+00 : f32
    %322 = vector.broadcast %cst_101 : f32 to vector<16x64xf32>
    %323 = arith.addf %322, %321 : vector<16x64xf32>
    %324 = arith.mulf %313, %323 : vector<16x64xf32>
    %325 = arith.truncf %324 : vector<16x64xf32> to vector<16x64xbf16>
    %c1_102 = arith.constant 1 : index
    %c0_103 = arith.constant 0 : index
    %c0_104 = arith.constant 0 : index
    %326 = vector.load %arg9[%c1_102, %c0_103, %c0_104] : memref<2x64x32xbf16, #tpu.memory_space<vmem>>, vector<1x64x32xbf16>
    %327 = vector.shape_cast %326 : vector<1x64x32xbf16> to vector<64x32xbf16>
    %cst_105 = arith.constant dense<0.000000e+00> : vector<16x32xf32>
    %328 = tpu.matmul %325, %327, %cst_105 {dimension_numbers = #tpu.dot_dimension_numbers<[1], [0], [0], [1], [0, 0, 1, 1], [], []>} : vector<16x64xbf16>, vector<64x32xbf16>, vector<16x32xf32> -> vector<16x32xf32>
    %329 = vector.extract_strided_slice %201 {offsets = [3, 0], sizes = [1, 32], strides = [1, 1]} : vector<4x96xf32> to vector<1x32xf32>
    %330 = vector.broadcast %329 : vector<1x32xf32> to vector<16x32xf32>
    %331 = arith.addf %328, %330 : vector<16x32xf32>
    %332 = arith.addf %304, %331 : vector<16x32xf32>
    %333 = vector.extract_strided_slice %203 {offsets = [2, 0], sizes = [1, 32], strides = [1, 1]} : vector<4x32xf32> to vector<1x32xf32>
    %334 = vector.extract_strided_slice %203 {offsets = [3, 0], sizes = [1, 32], strides = [1, 1]} : vector<4x32xf32> to vector<1x32xf32>
    %cst_106 = arith.constant dense<0.000000e+00> : vector<16xf32>
    %335 = vector.multi_reduction <add>, %332, %cst_106 [1] : vector<16x32xf32> to vector<16xf32>
    %336 = vector.shape_cast %335 : vector<16xf32> to vector<16x1xf32>
    %cst_107 = arith.constant 3.200000e+01 : f32
    %337 = vector.broadcast %cst_107 : f32 to vector<16x1xf32>
    %338 = arith.divf %336, %337 : vector<16x1xf32>
    %339 = vector.broadcast %338 : vector<16x1xf32> to vector<16x32xf32>
    %340 = arith.subf %332, %339 : vector<16x32xf32>
    %341 = arith.mulf %340, %340 : vector<16x32xf32>
    %cst_108 = arith.constant dense<0.000000e+00> : vector<16xf32>
    %342 = vector.multi_reduction <add>, %341, %cst_108 [1] : vector<16x32xf32> to vector<16xf32>
    %343 = vector.shape_cast %342 : vector<16xf32> to vector<16x1xf32>
    %cst_109 = arith.constant 3.200000e+01 : f32
    %344 = vector.broadcast %cst_109 : f32 to vector<16x1xf32>
    %345 = arith.divf %343, %344 : vector<16x1xf32>
    %346 = vector.broadcast %338 : vector<16x1xf32> to vector<16x32xf32>
    %347 = arith.subf %332, %346 : vector<16x32xf32>
    %cst_110 = arith.constant 9.99999974E-6 : f32
    %348 = vector.broadcast %cst_110 : f32 to vector<16x1xf32>
    %349 = arith.addf %345, %348 : vector<16x1xf32>
    %350 = math.rsqrt %349 : vector<16x1xf32>
    %351 = vector.broadcast %350 : vector<16x1xf32> to vector<16x32xf32>
    %352 = arith.mulf %347, %351 : vector<16x32xf32>
    %353 = vector.broadcast %333 : vector<1x32xf32> to vector<16x32xf32>
    %354 = arith.mulf %352, %353 : vector<16x32xf32>
    %355 = vector.broadcast %334 : vector<1x32xf32> to vector<16x32xf32>
    %356 = arith.addf %354, %355 : vector<16x32xf32>
    %357 = tpu.iota {dimensions = array<i32: 0>} : vector<2x16xi32>
    %358 = tpu.iota {dimensions = array<i32: 1>} : vector<2x16xi32>
    %c8_i32 = arith.constant 8 : i32
    %359 = vector.broadcast %c8_i32 : i32 to vector<2x16xi32>
    %360 = arith.muli %357, %359 : vector<2x16xi32>
    %361 = arith.cmpi eq, %358, %360 : vector<2x16xi32>
    %362 = arith.extui %361 : vector<2x16xi1> to vector<2x16xi32>
    %363 = arith.sitofp %362 : vector<2x16xi32> to vector<2x16xf32>
    %cst_111 = arith.constant dense<0.000000e+00> : vector<2x32xf32>
    %364 = tpu.matmul %363, %356, %cst_111 {dimension_numbers = #tpu.dot_dimension_numbers<[1], [0], [0], [1], [0, 0, 1, 1], [], []>} : vector<2x16xf32>, vector<16x32xf32>, vector<2x32xf32> -> vector<2x32xf32>
    %c0_112 = arith.constant 0 : index
    %c0_113 = arith.constant 0 : index
    %365 = vector.load %arg12[%c0_112, %c0_113] : memref<32x32xf32, #tpu.memory_space<vmem>>, vector<32x32xf32>
    %cst_114 = arith.constant dense<0.000000e+00> : vector<2x32xf32>
    %366 = tpu.matmul %364, %365, %cst_114 {dimension_numbers = #tpu.dot_dimension_numbers<[1], [0], [0], [1], [0, 0, 1, 1], [], []>} : vector<2x32xf32>, vector<32x32xf32>, vector<2x32xf32> -> vector<2x32xf32>
    %c0_115 = arith.constant 0 : index
    %c0_116 = arith.constant 0 : index
    %367 = vector.load %arg13[%c0_115, %c0_116] : memref<1x32xf32, #tpu.memory_space<vmem>>, vector<1x32xf32>
    %368 = vector.broadcast %367 : vector<1x32xf32> to vector<2x32xf32>
    %369 = arith.addf %366, %368 : vector<2x32xf32>
    %370 = math.tanh %369 : vector<2x32xf32>
    %c0_117 = arith.constant 0 : index
    %c0_118 = arith.constant 0 : index
    %371 = vector.load %arg14[%c0_117, %c0_118] : memref<32x5xf32, #tpu.memory_space<vmem>>, vector<32x5xf32>
    %cst_119 = arith.constant dense<0.000000e+00> : vector<2x5xf32>
    %372 = tpu.matmul %370, %371, %cst_119 {dimension_numbers = #tpu.dot_dimension_numbers<[1], [0], [0], [1], [0, 0, 1, 1], [], []>} : vector<2x32xf32>, vector<32x5xf32>, vector<2x5xf32> -> vector<2x5xf32>
    %c0_120 = arith.constant 0 : index
    %c0_121 = arith.constant 0 : index
    %373 = vector.load %arg15[%c0_120, %c0_121] : memref<1x5xf32, #tpu.memory_space<vmem>>, vector<1x5xf32>
    %374 = vector.broadcast %373 : vector<1x5xf32> to vector<2x5xf32>
    %375 = arith.addf %372, %374 : vector<2x5xf32>
    %c0_122 = arith.constant 0 : index
    %c0_123 = arith.constant 0 : index
    %376 = vector.load %arg16[%c0_122, %c0_123] : memref<2x5xf32, #tpu.memory_space<vmem>>, vector<2x5xf32>
    tpu.vector_store %arg16[%c0_122, %c0_123], %375 {strides = array<i32>} : memref<2x5xf32, #tpu.memory_space<vmem>>, vector<2x5xf32>,
    return
  }
}

</mosaic_0001>

<bundles_post_ra>
// kernel: roberta_pool_classifier_forward.1
= control target key start
LH: loop header
LB: loop body
LE: loop exit
PB: predicated region body
PF: predicated region fallthrough
CT: control target
= control target key end

     0   :  { %s5077_s0 = inlined_call_operand.vmem [shape: s32[16,1], index: 0, kind: input, shape index: {}]   ;;  %s5078_s1 = inlined_call_operand.vmem [shape: f32[2,1,8], index: 1, kind: input, shape index: {}]   ;;  %s5079_s2 = inlined_call_operand.vmem [shape: f32[100,32], index: 2, kind: input, shape index: {}]   ;;  %s5080_s3 = inlined_call_operand.vmem [shape: f32[64,32], index: 3, kind: input, shape index: {}]   ;;  %s5081_s4 = inlined_call_operand.vmem [shape: f32[1,32], index: 4, kind: input, shape index: {}]   ;;  %s5082_s5 = inlined_call_operand.vmem [shape: f32[2,32], index: 5, kind: input, shape index: {}]   ;;  %s5083_s6 = inlined_call_operand.vmem [shape: bf16[2,32,96], index: 6, kind: input, shape index: {}]   ;;  %s5084_s7 = inlined_call_operand.vmem [shape: bf16[2,32,32], index: 7, kind: input, shape index: {}]   ;;  %s5085_s8 = inlined_call_operand.vmem [shape: bf16[2,32,64], index: 8, kind: input, shape index: {}]   ;;  %s5086_s9 = inlined_call_operand.vmem [shape: bf16[2,64,32], index: 9, kind: input, shape index: {}]   ;;  %s5087_s10 = inlined_call_operand.vmem [shape: f32[2,4,96], index: 10, kind: input, shape index: {}]   ;;  %s5088_s11 = inlined_call_operand.vmem [shape: f32[2,4,32], index: 11, kind: input, shape index: {}]   ;;  %s5089_s12 = inlined_call_operand.vmem [shape: f32[32,32], index: 12, kind: input, shape index: {}]   ;;  %s5090_s13 = inlined_call_operand.vmem [shape: f32[1,32], index: 13, kind: input, shape index: {}]   ;;  %s5091_s14 = inlined_call_operand.vmem [shape: f32[32,5], index: 14, kind: input, shape index: {}]   ;;  %s5092_s15 = inlined_call_operand.vmem [shape: f32[1,5], index: 15, kind: input, shape index: {}]   ;;  %s5093_s16 = inlined_call_operand.hbm [shape: f32[2,5], index: 16, kind: output, shape index: {}]  }
   0x1   :  { %5097 = sst [smem:[#allocation5_spill]] %s5077_s0 }
   0x2   :  { %s5098_s23 = sld [smem:[#allocation5_spill]]  ;;  %v83_v1 = vld [vmem:[%s5079_s2 + $0x60] sm:$0xf]  ;;  %vm100_vm0 = vcmask 1043456   ;;  %v4276_v2 = vmov 0   ;;  %v82_v3 = vld [vmem:[%s5079_s2 + $0x58] sm:$0xff] }
   0x3   :  { %4109 = vset.pattern.permute.xlu0 %v4276_v2  ;;  %3785 = vmatprep.subr.msk.mxu0 %vm100_vm0, %v83_v1  ;;  %v81_v4 = vld [vmem:[%s5079_s2 + $0x50] sm:$0xff]  ;;  %v4277_v6 = vmov 0.0   ;;  %v80_v7 = vld [vmem:[%s5079_s2 + $0x48] sm:$0xff]  ;;  %v79_v8 = vld [vmem:[%s5079_s2 + $0x40] sm:$0xff] }
   0x4   :  { %3786 = vmatpush3.msk.msra.mxu0 %vm100_vm0, %v83_v1  ;;  %3814 = vmatprep.subr.bf16.mxu1 %v4277_v6  ;;  %v78_v9 = vld [vmem:[%s5079_s2 + $0x38] sm:$0xff]  ;;  %v77_v10 = vld [vmem:[%s5079_s2 + $0x30] sm:$0xff]  ;;  %v76_v11 = vld [vmem:[%s5079_s2 + $0x28] sm:$0xff] }
   0x5   :  { %3787 = vmatprep.subr.mxu0 %v82_v3  ;;  %v75_v12 = vld [vmem:[%s5079_s2 + $0x20] sm:$0xff]  ;;  %v74_v13 = vld [vmem:[%s5079_s2 + $0x18] sm:$0xff]  ;;  %v73_v14 = vld [vmem:[%s5079_s2 + $0x10] sm:$0xff] }
   0x6   :  { %3788 = vmatpush3.msra.mxu0 %v82_v3 }
   0x7   :  { %3789 = vmatprep.subr.mxu0 %v81_v4 }
   0x8   :  { %v55_v0 = vld [vmem:[%s5098_s23] sm:$0xff]  ;;  %v56_v5 = vld [vmem:[%s5098_s23 + $0x8] sm:$0xff]  ;;  %3790 = vmatpush3.msra.mxu0 %v81_v4 }
   0x9   :  { %60 = vperm.xlu0 %4109, %v55_v0   ;;  %3791 = vmatprep.subr.mxu0 %v80_v7 }
   0xa   :  { %3792 = vmatpush3.msra.mxu0 %v80_v7 }
   0xb   :  { %3793 = vmatprep.subr.mxu0 %v79_v8 }
   0xc   :  { %3794 = vmatpush3.msra.mxu0 %v79_v8 }
   0xd   :  { %63 = vperm.xlu0 %4109, %v56_v5   ;;  %3795 = vmatprep.subr.mxu0 %v78_v9 }
   0xe   :  { %3796 = vmatpush3.msra.mxu0 %v78_v9 }
   0xf   :  { %3797 = vmatprep.subr.mxu0 %v77_v10 }
  0x10   :  { %3798 = vmatpush3.msra.mxu0 %v77_v10 }
  0x11   :  { %3799 = vmatprep.subr.mxu0 %v76_v11 }
  0x12   :  { %3800 = vmatpush3.msra.mxu0 %v76_v11 }
  0x13   :  { %3801 = vmatprep.subr.mxu0 %v75_v12 }
  0x14   :  { %3802 = vmatpush3.msra.mxu0 %v75_v12 }
  0x15   :  { %3803 = vmatprep.subr.mxu0 %v74_v13 }
  0x16   :  { %21 = vsyncpa [#allocation3], 0  ;;  %3804 = vmatpush3.msra.mxu0 %v74_v13  ;;  %v72_v15 = vld [vmem:[%s5079_s2 + $0x8] sm:$0xff]  ;;  %v71_v16 = vld [vmem:[%s5079_s2] sm:$0xff]  ;;  %v57_v17 = vlaneseq  ;;  %vm93_vm1 = vcmask 818176   ;;  %vm181_vm4 = vcmask 261120  }
  0x17   :  { %3805 = vmatprep.subr.mxu0 %v73_v14  ;;  %v84_v23 = vld [vmem:[%s5080_s3 + $0x2] sm:$0xff]  ;;  %v3555_v24 = vld [vmem:[%s5081_s4] ss:$0 sm:$0xff]  ;;  %vm4278_vm5 = vmmov 0   ;;  %v3560_v56 = vld [vmem:[%s5082_s5 + $0x1] ss:$0 sm:$0xff] }
  0x18   :  { %3806 = vmatpush3.msra.mxu0 %v73_v14  ;;  %v4429_v18 = vand.u32 127, %v57_v17  ;;  %v92_v26 = vadd.f32 %v3555_v24, %v84_v23  ;;  %v4140_v42 = vld [vmem:[%s5083_s6 + $0x8] sm:$0xff]   ;;  %3818 = vmatprep.mubr.msk.bf16.mxu1 %vm4278_vm5, %v4277_v6  ;;  %v4141_v43 = vld [vmem:[%s5083_s6] sm:$0xff]   ;;  %v4473_v61 = vshrl.u32 %v57_v17, 7  ;;  %s4279_s17 = smov 96   ;;  %s4280_s18 = smov 88  }
  0x19   :  { %3807 = vmatprep.subr.mxu0 %v72_v15  ;;  %3815 = vmatpush3.bf16.msra.mxu1 %v4140_v42  ;;  %v3559_v52 = vld [vmem:[%s5082_s5] ss:$0 sm:$0xff]  ;;  %s4281_s19 = smov 120   ;;  %s4282_s20 = smov 72   ;;  %vm297_vm6 = vcmask 64512   ;;  %vm1447_vm7 = vcmask 130048  }
  0x1a   :  { %3808 = vmatpush3.msra.mxu0 %v72_v15  ;;  %3816 = vmatprep.subr.bf16.mxu1 %v4277_v6  ;;  %v4476_v62 = vsub.s32 0, %v4473_v61  ;;  %v4481_v63 = vld [vmem:[%s5087_s10] sm:$0xf]  ;;  %s4283_s21 = smov 104   ;;  %s4284_s2 = smov 80   ;;  %vm1450_vm8 = vcmask 195584  }
  0x1b   :  { %3809 = vmatprep.subr.mxu0 %v71_v16  ;;  %s4285_s22 = smov 112   ;;  %s4286_s23 = smov 64   ;;  %vm1678_vm9 = vcmask 523264   ;;  %vm3537_vm11 = vcmask 33792  }
  0x1c   :  { %3810 = vmatpush3.msra.mxu0 %v71_v16  ;;  %v237_v0 = vrot.slane %v4481_v63, %v4476_v62  ;;  %s4288_s26 = smov 48   ;;  %s4289_s27 = smov 40  }
  0x1d   :  { %3852 = vmatprep.subr.mxu0 %v4277_v6  ;;  %3817 = vmatpush3.bf16.msra.mxu1 %v4141_v43  ;;  %s4290_s28 = smov 8   ;;  %s5096_s24 = smov 16  }
  0x1e   :  { %3822 = vmatprep.subr.mxu1 %v4277_v6  ;;  %s5095_s3 = smov 24  }
  0x84   :  { %v61_v19 = vpop.permute.xlu0 %60 }
  0x85   :  { %vm65_vm2 = vcmp.eq.s32.totalorder %v61_v19, %v4429_v18 }
  0x86   :  { %v3553_v20 = vsel %vm65_vm2, 1.0, %v4277_v6 }
  0x87   :  { %3811 = vmatprep.mubr.msk.f32.mxu0 %vm93_vm1, %v3553_v20 }
  0x88   :  { %v64_v21 = vpop.permute.xlu0 %63 }
  0x89   :  { %vm66_vm3 = vcmp.eq.s32.totalorder %v64_v21, %v4429_v18 }
  0x8a   :  { %v3554_v22 = vsel %vm66_vm3, 1.0, %v4277_v6 }
  0x8b   :  { %3812 = vmatmul.mubr.msk.f32.vlgmr.msra.gmra.mxu0 %vm93_vm1, %v3554_v22 }
  0x8c   :  { %3854 = vmatprep.mubr.msk.f32.mxu0 %vm4278_vm5, %v4277_v6 }
 0x14b   :  { %v3813_v25 = vpop.f32.mrf.mxu0 }
 0x14c   :  { %v176_v29 = vadd.f32 %v3813_v25, %v92_v26 }
 0x14d   :  { %v170_v27 = vpop.f32.mrf.mxu0 }
 0x14e   :  { %v171_v28 = vadd.f32 %v170_v27, %v92_v26  ;;  %v185_v31 = vsel %vm181_vm4, %v176_v29, 0.0  ;;  %v221_v26 = vld [vmem:[%s5078_s1] sm:$0x1] }
 0x14f   :  { %v223_v27 = vsub.f32 1.0, %v221_v26 }
 0x150   :  { %v182_v30 = vsel %vm181_vm4, %v171_v28, 0.0 }
 0x151   :  { %183 = vadd.xlane.f32.xlu1 %v182_v30  ;;  %v222_v30 = vld [vmem:[%s5078_s1 + $0x1] sm:$0x1]  ;;  %s4287_s1 = smov 56  }
 0x155   :  { %186 = vadd.xlane.f32.xlu1 %v185_v31 }
 0x1da   :  { %v184_v32 = vpop.xlane.xlu1 %183 }
 0x1db   :  { %v189_v33 = vmul.f32 0.03125, %v184_v32 }
 0x1dd   :  { %v191_v34 = vsub.f32 %v171_v28, %v189_v33  ;;  %v225_v28 = vmul.f32 -1e+09, %v223_v27  ;;  %v224_v33 = vsub.f32 1.0, %v222_v30 }
 0x1de   :  { %v187_v35 = vpop.xlane.xlu1 %186 }
 0x1df   :  { %v190_v36 = vmul.f32 0.03125, %v187_v35  ;;  %v193_v37 = vmul.f32 %v191_v34, %v191_v34 }
 0x1e1   :  { %v192_v38 = vsub.f32 %v176_v29, %v190_v36  ;;  %v195_v39 = vsel %vm181_vm4, %v193_v37, 0.0  ;;  %v4559_v29 = vrot.slane %v225_v28, %v4476_v62  ;;  %v226_v36 = vmul.f32 -1e+09, %v224_v33 }
 0x1e2   :  { %196 = vadd.xlane.f32.xlu0 %v195_v39 }
 0x1e3   :  { %v194_v40 = vmul.f32 %v192_v38, %v192_v38 }
 0x1e5   :  { %v198_v41 = vsel %vm181_vm4, %v194_v40, 0.0 }
 0x1e6   :  { %199 = vadd.xlane.f32.xlu1 %v198_v41 }
 0x26b   :  { %v197_v44 = vpop.xlane.xlu0 %196 }
 0x26c   :  { %v201_v45 = vmul.f32 0.03125, %v197_v44 }
 0x26e   :  { %v203_v46 = vadd.f32 1e-05, %v201_v45 }
 0x26f   :  { %v200_v47 = vpop.xlane.xlu1 %199 }
 0x270   :  { %4160 = vrsqrt.f32 %v203_v46  ;;  %v202_v48 = vmul.f32 0.03125, %v200_v47 }
 0x272   :  { %v204_v49 = vadd.f32 1e-05, %v202_v48 }
 0x274   :  { %4162 = vrsqrt.f32 %v204_v49 }
 0x27d   :  { %v4161_v50 = vpop.eup %4160 }
 0x27e   :  { %v207_v51 = vmul.f32 %v4161_v50, %v191_v34 }
 0x280   :  { %v213_v55 = vmul.f32 %v3559_v52, %v207_v51 }
 0x281   :  { %v4163_v53 = vpop.eup %4162 }
 0x282   :  { %v208_v54 = vmul.f32 %v4163_v53, %v192_v38  ;;  %v4463_v58 = vadd.f32 %v3560_v56, %v213_v55  ;;  %v4567_v38 = vrot.slane %v226_v36, %v4476_v62 }
 0x284   :  { %v214_v57 = vmul.f32 %v3559_v52, %v208_v54 }
 0x286   :  { %v4465_v59 = vadd.f32 %v3560_v56, %v214_v57 }
 0x288   :  { %v229_v60 = vpack.c.bf16 %v4465_v59, %v4463_v58 }
 0x28a   :  { %3819 = vmatmul.mubr.msk.bf16.vlgmr.msra.gmra.mxu1 %vm181_vm4, %v229_v60 }
 0x28b   :  { %3824 = vmatprep.mubr.msk.f32.mxu1 %vm4278_vm5, %v4277_v6 }
 0x34a   :  { %v287_v1 = vpop.f32.mrf.mxu1 }
 0x34b   :  { %v288_v2 = vadd.f32 %v287_v1, %v237_v0 }
 0x34c   :  { %v3820_v3 = vpop.f32.mrf.mxu1 }
 0x34d   :  { %295 = vrot.lane.b32.xlu1 %v288_v2, %s4279_s17  ;;  %v4508_v8 = vpack.c.bf16 %v288_v2, %v288_v2 }
 0x34e   :  { %v290_v4 = vpop.f32.mrf.mxu1 }
 0x34f   :  { %v4486_v5 = vadd.f32 %v290_v4, %v237_v0 }
 0x350   :  { %v3821_v7 = vpop.f32.mrf.mxu1 }
 0x351   :  { %451 = vrot.lane.b32.xlu1 %v288_v2, %s4280_s18  ;;  %529 = vrot.lane.b32.xlu0 %v4486_v5, %s4280_s18 }
 0x355   :  { %449 = vrot.lane.b32.xlu1 %v288_v2, %s4281_s19  ;;  %763 = vrot.lane.b32.xlu0 %v288_v2, %s4282_s20 }
 0x359   :  { %761 = vrot.lane.b32.xlu0 %v288_v2, %s4283_s21  ;;  %373 = vrot.lane.b32.xlu1 %v4486_v5, %s4279_s17 }
 0x35d   :  { %607 = vrot.lane.b32.xlu1 %v288_v2, %s4284_s2 }
 0x361   :  { %605 = vrot.lane.b32.xlu1 %v288_v2, %s4285_s22 }
 0x365   :  { %527 = vrot.lane.b32.xlu1 %v4486_v5, %s4281_s19 }
 0x369   :  { %685 = vrot.lane.b32.xlu1 %v4486_v5, %s4284_s2 }
 0x36d   :  { %683 = vrot.lane.b32.xlu1 %v4486_v5, %s4285_s22 }
 0x371   :  { %841 = vrot.lane.b32.xlu1 %v4486_v5, %s4282_s20 }
 0x375   :  { %839 = vrot.lane.b32.xlu1 %v4486_v5, %s4283_s21 }
 0x379   :  { %1030 = vrot.lane.b32.xlu1 %v4508_v8, %s4286_s23 }
 0x3bf   :  { %v296_v9 = vpop.permute.xlu1 %295 }
 0x3c0   :  { %3823 = vmatpush3.xpose.msk.msra.mxu1 %vm297_vm6, %v296_v9 }
 0x3c1   :  { %3827 = vmatprep.subr.mxu1 %v4277_v6 }
 0x3c3   :  { %3825 = vmatmul.mubr.msk.f32.vlgmr.msra.gmra.mxu1 %vm297_vm6, %v288_v2  ;;  %v452_v10 = vpop.permute.xlu1 %451  ;;  %v530_v11 = vpop.permute.xlu0 %529 }
 0x3c4   :  { %3829 = vmatprep.mubr.msk.f32.mxu1 %vm4278_vm5, %v4277_v6 }
 0x3c7   :  { %v450_v12 = vpop.permute.xlu1 %449  ;;  %v764_v13 = vpop.permute.xlu0 %763 }
 0x3c8   :  { %3853 = vmatpush3.xpose.msk.msra.mxu0 %vm297_vm6, %v764_v13 }
 0x3c9   :  { %3862 = vmatprep.subr.bf16.mxu0 %v4277_v6 }
 0x3cb   :  { %v762_v14 = vpop.permute.xlu0 %761  ;;  %v374_v15 = vpop.permute.xlu1 %373 }
 0x3cc   :  { %3828 = vmatpush3.xpose.msk.msra.mxu1 %vm297_vm6, %v374_v15  ;;  %3855 = vmatmul.mubr.msk.f32.vlgmr.msra.gmra.mxu0 %vm297_vm6, %v762_v14 }
 0x3cd   :  { %3832 = vmatprep.subr.mxu1 %v4277_v6  ;;  %3864 = vmatprep.mubr.msk.bf16.mxu0 %vm4278_vm5, %v4277_v6 }
 0x3cf   :  { %3830 = vmatmul.mubr.msk.f32.vlgmr.msra.gmra.mxu1 %vm297_vm6, %v4486_v5  ;;  %v608_v16 = vpop.permute.xlu1 %607 }
 0x3d0   :  { %3833 = vmatpush3.xpose.msk.msra.mxu1 %vm297_vm6, %v452_v10  ;;  %3834 = vmatprep.mubr.msk.f32.mxu1 %vm4278_vm5, %v4277_v6  ;;  %v4593_v10 = vpack.c.bf16 %v4486_v5, %v4486_v5 }
 0x3d1   :  { %3837 = vmatprep.subr.mxu1 %v4277_v6 }
 0x3d3   :  { %3835 = vmatmul.mubr.msk.f32.vlgmr.msra.gmra.mxu1 %vm297_vm6, %v450_v12  ;;  %v606_v17 = vpop.permute.xlu1 %605 }
 0x3d4   :  { %3838 = vmatpush3.xpose.msk.msra.mxu1 %vm297_vm6, %v530_v11  ;;  %3839 = vmatprep.mubr.msk.f32.mxu1 %vm4278_vm5, %v4277_v6 }
 0x3d5   :  { %3842 = vmatprep.subr.mxu1 %v4277_v6 }
 0x3d7   :  { %v528_v19 = vpop.permute.xlu1 %527 }
 0x3d8   :  { %3840 = vmatmul.mubr.msk.f32.vlgmr.msra.gmra.mxu1 %vm297_vm6, %v528_v19 }
 0x3d9   :  { %3843 = vmatpush3.xpose.msk.msra.mxu1 %vm297_vm6, %v608_v16  ;;  %3844 = vmatprep.mubr.msk.f32.mxu1 %vm4278_vm5, %v4277_v6 }
 0x3da   :  { %3847 = vmatprep.subr.mxu1 %v4277_v6 }
 0x3db   :  { %v686_v20 = vpop.permute.xlu1 %685 }
 0x3dc   :  { %3845 = vmatmul.mubr.msk.f32.vlgmr.msra.gmra.mxu1 %vm297_vm6, %v606_v17 }
 0x3dd   :  { %3848 = vmatpush3.xpose.msk.msra.mxu1 %vm297_vm6, %v686_v20  ;;  %3849 = vmatprep.mubr.msk.f32.mxu1 %vm4278_vm5, %v4277_v6 }
 0x3de   :  { %3857 = vmatprep.subr.mxu1 %v4277_v6 }
 0x3df   :  { %v684_v21 = vpop.permute.xlu1 %683 }
 0x3e0   :  { %3850 = vmatmul.mubr.msk.f32.vlgmr.msra.gmra.mxu1 %vm297_vm6, %v684_v21 }
 0x3e1   :  { %3859 = vmatprep.mubr.msk.f32.mxu1 %vm4278_vm5, %v4277_v6 }
 0x3e3   :  { %v842_v22 = vpop.permute.xlu1 %841 }
 0x3e4   :  { %3858 = vmatpush3.xpose.msk.msra.mxu1 %vm297_vm6, %v842_v22 }
 0x3e5   :  { %3868 = vmatprep.subr.bf16.mxu1 %v4277_v6 }
 0x3e7   :  { %v840_v23 = vpop.permute.xlu1 %839 }
 0x3e8   :  { %3860 = vmatmul.mubr.msk.f32.vlgmr.msra.gmra.mxu1 %vm297_vm6, %v840_v23 }
 0x3e9   :  { %3870 = vmatprep.mubr.msk.bf16.mxu1 %vm4278_vm5, %v4277_v6 }
 0x3eb   :  { %v1031_v24 = vpop.permute.xlu1 %1030 }
 0x3ec   :  { %v1036_v25 = vsel %vm100_vm0, %v1031_v24, 0 }
 0x3ed   :  { %3863 = vmatpush3.bf16.msra.mxu0 %v1036_v25 }
 0x3ee   :  { %3874 = vmatprep.subr.bf16.mxu0 %v4277_v6 }
 0x483   :  { %v368_v31 = vpop.f32.mrf.mxu1 }
 0x484   :  { %v929_v32 = vadd.f32 %v4559_v29, %v368_v31 }
 0x485   :  { %v3826_v34 = vpop.f32.mrf.mxu1 }
 0x486   :  { %v937_v35 = vsel %vm297_vm6, %v929_v32, -inf }
 0x487   :  { %938 = vmax.xlane.f32.xlu0 %v937_v35 }
 0x48c   :  { %v835_v37 = vpop.f32.mrf.mxu0 }
 0x48d   :  { %v932_v39 = vadd.f32 %v4559_v29, %v835_v37 }
 0x48e   :  { %v3856_v40 = vpop.f32.mrf.mxu0 }
 0x48f   :  { %v445_v41 = vpop.f32.mrf.mxu1  ;;  %v946_v42 = vsel %vm297_vm6, %v932_v39, -inf }
 0x490   :  { %v933_v43 = vadd.f32 %v4567_v38, %v445_v41  ;;  %947 = vmax.xlane.f32.xlu1 %v946_v42 }
 0x491   :  { %v3831_v44 = vpop.f32.mrf.mxu1 }
 0x492   :  { %v949_v45 = vsel %vm297_vm6, %v933_v43, -inf }
 0x493   :  { %v523_v46 = vpop.f32.mrf.mxu1 }
 0x494   :  { %v930_v47 = vadd.f32 %v4559_v29, %v523_v46  ;;  %950 = vmax.xlane.f32.xlu1 %v949_v45 }
 0x495   :  { %v3836_v48 = vpop.f32.mrf.mxu1 }
 0x496   :  { %v940_v49 = vsel %vm297_vm6, %v930_v47, -inf }
 0x497   :  { %941 = vmax.xlane.f32.xlu0 %v940_v49 }
 0x498   :  { %v601_v50 = vpop.f32.mrf.mxu1 }
 0x499   :  { %v934_v51 = vadd.f32 %v4567_v38, %v601_v50 }
 0x49a   :  { %v3841_v52 = vpop.f32.mrf.mxu1 }
 0x49b   :  { %v952_v53 = vsel %vm297_vm6, %v934_v51, -inf }
 0x49c   :  { %953 = vmax.xlane.f32.xlu0 %v952_v53  ;;  %v679_v54 = vpop.f32.mrf.mxu1 }
 0x49d   :  { %v4578_v55 = vadd.f32 %v4559_v29, %v679_v54 }
 0x49e   :  { %v3846_v56 = vpop.f32.mrf.mxu1 }
 0x49f   :  { %v943_v57 = vsel %vm297_vm6, %v4578_v55, -inf }
 0x4a0   :  { %944 = vmax.xlane.f32.xlu1 %v943_v57  ;;  %v757_v60 = vpop.f32.mrf.mxu1 }
 0x4a1   :  { %v4583_v0 = vadd.f32 %v4567_v38, %v757_v60 }
 0x4a2   :  { %v3851_v1 = vpop.f32.mrf.mxu1 }
 0x4a3   :  { %v955_v2 = vsel %vm297_vm6, %v4583_v0, -inf }
 0x4a4   :  { %956 = vmax.xlane.f32.xlu0 %v955_v2 }
 0x4a8   :  { %v913_v3 = vpop.f32.mrf.mxu1 }
 0x4a9   :  { %v936_v4 = vadd.f32 %v4567_v38, %v913_v3 }
 0x4aa   :  { %v3861_v7 = vpop.f32.mrf.mxu1 }
 0x4ab   :  { %v958_v9 = vsel %vm297_vm6, %v936_v4, -inf }
 0x4ac   :  { %959 = vmax.xlane.f32.xlu0 %v958_v9 }
 0x4b1   :  { %1129 = vrot.lane.b32.xlu1 %v4508_v8, %s4287_s1 }
 0x4b5   :  { %1177 = vrot.lane.b32.xlu1 %v4593_v10, %s4287_s1 }
 0x4c2   :  { %1079 = vrot.lane.b32.xlu0 %v4593_v10, %s4286_s23 }
 0x510   :  { %v939_v11 = vpop.xlane.xlu0 %938 }
 0x511   :  { %v961_v12 = vsub.f32 %v929_v32, %v939_v11 }
 0x513   :  { %v969_v13 = vmul.f32 1.442695, %v961_v12 }
 0x515   :  { %4164 = vpow2.f32 %v969_v13 }
 0x519   :  { %v948_v14 = vpop.xlane.xlu1 %947 }
 0x51a   :  { %v964_v15 = vsub.f32 %v932_v39, %v948_v14 }
 0x51c   :  { %v975_v16 = vmul.f32 1.442695, %v964_v15 }
 0x51d   :  { %v951_v17 = vpop.xlane.xlu1 %950 }
 0x51e   :  { %4166 = vpow2.f32 %v975_v16  ;;  %v965_v19 = vsub.f32 %v933_v43, %v951_v17 }
 0x520   :  { %v977_v20 = vmul.f32 1.442695, %v965_v19  ;;  %v942_v21 = vpop.xlane.xlu0 %941 }
 0x521   :  { %v962_v5 = vsub.f32 %v930_v47, %v942_v21 }
 0x522   :  { %v4165_v22 = vpop.eup %4164  ;;  %4168 = vpow2.f32 %v977_v20 }
 0x523   :  { %v971_v23 = vmul.f32 1.442695, %v962_v5  ;;  %v985_v24 = vsel %vm297_vm6, %v4165_v22, 0.0 }
 0x524   :  { %986 = vadd.xlane.f32.xlu1 %v985_v24 }
 0x525   :  { %4170 = vpow2.f32 %v971_v23  ;;  %v954_v25 = vpop.xlane.xlu0 %953 }
 0x526   :  { %v966_v26 = vsub.f32 %v934_v51, %v954_v25 }
 0x528   :  { %v979_v27 = vmul.f32 1.442695, %v966_v26 }
 0x529   :  { %v945_v42 = vpop.xlane.xlu1 %944 }
 0x52a   :  { %4172 = vpow2.f32 %v979_v27  ;;  %v963_v43 = vsub.f32 %v4578_v55, %v945_v42 }
 0x52b   :  { %v4600_v28 = vpop.eup %4166 }
 0x52c   :  { %v994_v30 = vsel %vm297_vm6, %v4600_v28, 0.0  ;;  %v973_v44 = vmul.f32 1.442695, %v963_v43 }
 0x52d   :  { %995 = vadd.xlane.f32.xlu1 %v994_v30  ;;  %v957_v33 = vpop.xlane.xlu0 %956  ;;  %v1130_v55 = vpop.permute.xlu1 %1129 }
 0x52e   :  { %v967_v45 = vsub.f32 %v4583_v0, %v957_v33  ;;  %4174 = vpow2.f32 %v973_v44  ;;  %v1135_v7 = vsel %vm100_vm0, %v1130_v55, 0 }
 0x52f   :  { %v4169_v31 = vpop.eup %4168 }
 0x530   :  { %v997_v32 = vsel %vm297_vm6, %v4169_v31, 0.0  ;;  %v981_v46 = vmul.f32 1.442695, %v967_v45 }
 0x531   :  { %998 = vadd.xlane.f32.xlu0 %v997_v32  ;;  %v1178_v56 = vpop.permute.xlu1 %1177 }
 0x532   :  { %v4171_v34 = vpop.eup %4170  ;;  %4176 = vpow2.f32 %v981_v46  ;;  %v1183_v14 = vsel %vm100_vm0, %v1178_v56, 0 }
 0x533   :  { %v988_v35 = vsel %vm297_vm6, %v4171_v34, 0.0 }
 0x534   :  { %989 = vadd.xlane.f32.xlu1 %v988_v35 }
 0x535   :  { %v960_v36 = vpop.xlane.xlu0 %959 }
 0x536   :  { %v968_v47 = vsub.f32 %v936_v4, %v960_v36 }
 0x537   :  { %v4606_v37 = vpop.eup %4172 }
 0x538   :  { %v1000_v39 = vsel %vm297_vm6, %v4606_v37, 0.0  ;;  %v983_v48 = vmul.f32 1.442695, %v968_v47 }
 0x539   :  { %1001 = vadd.xlane.f32.xlu0 %v1000_v39  ;;  %v1080_v40 = vpop.permute.xlu0 %1079 }
 0x53a   :  { %v1085_v41 = vsel %vm100_vm0, %v1080_v40, 0  ;;  %4178 = vpow2.f32 %v983_v48 }
 0x53b   :  { %3869 = vmatpush3.bf16.msra.mxu1 %v1085_v41  ;;  %v4618_v49 = vpop.eup %4174 }
 0x53c   :  { %3880 = vmatprep.subr.bf16.mxu1 %v4277_v6  ;;  %v991_v50 = vsel %vm297_vm6, %v4618_v49, 0.0 }
 0x53f   :  { %v4622_v51 = vpop.eup %4176 }
 0x540   :  { %v1003_v52 = vsel %vm297_vm6, %v4622_v51, 0.0 }
 0x545   :  { %1275 = vrot.lane.b32.xlu1 %v4593_v10, %s4288_s26 }
 0x547   :  { %v4626_v53 = vpop.eup %4178 }
 0x548   :  { %v1006_v54 = vsel %vm297_vm6, %v4626_v53, 0.0 }
 0x54f   :  { %1227 = vrot.lane.b32.xlu0 %v4508_v8, %s4288_s26 }
 0x569   :  { %992 = vadd.xlane.f32.xlu1 %v991_v50 }
 0x56e   :  { %1004 = vadd.xlane.f32.xlu0 %v1003_v52 }
 0x572   :  { %1007 = vadd.xlane.f32.xlu0 %v1006_v54 }
 0x57a   :  { %1373 = vrot.lane.b32.xlu1 %v4593_v10, %s4289_s27 }
 0x588   :  { %1325 = vrot.lane.b32.xlu0 %v4508_v8, %s4289_s27 }
 0x5ad   :  { %v987_v57 = vpop.xlane.xlu1 %986 }
 0x5ae   :  { %4180 = vrcp.f32 %v987_v57 }
 0x5b6   :  { %v996_v60 = vpop.xlane.xlu1 %995 }
 0x5ba   :  { %v999_v0 = vpop.xlane.xlu0 %998 }
 0x5bb   :  { %v4181_v1 = vpop.eup %4180  ;;  %4182 = vrcp.f32 %v999_v0 }
 0x5bc   :  { %v1017_v2 = vmul.f32 %v4181_v1, %v4165_v22 }
 0x5bd   :  { %v990_v3 = vpop.xlane.xlu1 %989 }
 0x5be   :  { %4184 = vrcp.f32 %v990_v3  ;;  %v1025_v4 = vpack.c.bf16 %v1017_v2, %v1017_v2  ;;  %v4142_v2 = vld [vmem:[%s5084_s7 + $0x8] sm:$0xff]  }
 0x5c0   :  { %3865 = vmatmul.mubr.msk.bf16.vlgmr.msra.gmra.mxu0 %vm297_vm6, %v1025_v4 }
 0x5c1   :  { %3875 = vmatpush3.bf16.msra.mxu0 %v1135_v7  ;;  %3876 = vmatprep.mubr.msk.bf16.mxu0 %vm4278_vm5, %v4277_v6  ;;  %v1276_v21 = vpop.permute.xlu1 %1275 }
 0x5c2   :  { %v1002_v8 = vpop.xlane.xlu0 %1001  ;;  %3886 = vmatprep.subr.bf16.mxu0 %v4277_v6  ;;  %v1281_v22 = vsel %vm100_vm0, %v1276_v21, 0 }
 0x5c3   :  { %4186 = vrcp.f32 %v1002_v8  ;;  %v4143_v8 = vld [vmem:[%s5084_s7] sm:$0xff]  }
 0x5c6   :  { %v1228_v15 = vpop.permute.xlu0 %1227 }
 0x5c7   :  { %v1233_v19 = vsel %vm100_vm0, %v1228_v15, 0 }
 0x5c8   :  { %v4183_v9 = vpop.eup %4182 }
 0x5c9   :  { %v1021_v10 = vmul.f32 %v4183_v9, %v4169_v31 }
 0x5cb   :  { %v4185_v11 = vpop.eup %4184  ;;  %v1026_v12 = vpack.c.bf16 %v1021_v10, %v1021_v10 }
 0x5cc   :  { %v1018_v13 = vmul.f32 %v4185_v11, %v4171_v34 }
 0x5cd   :  { %3871 = vmatmul.mubr.msk.bf16.vlgmr.msra.gmra.mxu1 %vm297_vm6, %v1026_v12 }
 0x5ce   :  { %3881 = vmatpush3.bf16.msra.mxu1 %v1183_v14  ;;  %v1127_v16 = vpack.c.bf16 %v1018_v13, %v1018_v13  ;;  %3882 = vmatprep.mubr.msk.bf16.mxu1 %vm4278_vm5, %v4277_v6 }
 0x5cf   :  { %3892 = vmatprep.subr.bf16.mxu1 %v4277_v6 }
 0x5d0   :  { %v4187_v17 = vpop.eup %4186  ;;  %3877 = vmatmul.mubr.msk.bf16.vlgmr.msra.gmra.mxu0 %vm297_vm6, %v1127_v16 }
 0x5d1   :  { %3887 = vmatpush3.bf16.msra.mxu0 %v1233_v19  ;;  %v1022_v20 = vmul.f32 %v4187_v17, %v4606_v37  ;;  %3888 = vmatprep.mubr.msk.bf16.mxu0 %vm4278_vm5, %v4277_v6 }
 0x5d2   :  { %3898 = vmatprep.subr.bf16.mxu0 %v4277_v6 }
 0x5d3   :  { %v1128_v5 = vpack.c.bf16 %v1022_v20, %v1022_v20 }
 0x5d5   :  { %3883 = vmatmul.mubr.msk.bf16.vlgmr.msra.gmra.mxu1 %vm297_vm6, %v1128_v5 }
 0x5d6   :  { %3893 = vmatpush3.bf16.msra.mxu1 %v1281_v22  ;;  %3894 = vmatprep.mubr.msk.bf16.mxu1 %vm4278_vm5, %v4277_v6 }
 0x5d7   :  { %3904 = vmatprep.subr.bf16.mxu1 %v4277_v6 }
 0x5f2   :  { %v993_v23 = vpop.xlane.xlu1 %992 }
 0x5f3   :  { %4188 = vrcp.f32 %v993_v23 }
 0x5f4   :  { %4190 = vrcp.f32 %v996_v60 }
 0x5f6   :  { %v1374_v36 = vpop.permute.xlu1 %1373 }
 0x5f7   :  { %v1005_v24 = vpop.xlane.xlu0 %1004  ;;  %v1379_v41 = vsel %vm100_vm0, %v1374_v36, 0 }
 0x5f8   :  { %4192 = vrcp.f32 %v1005_v24 }
 0x5fb   :  { %v1008_v25 = vpop.xlane.xlu0 %1007 }
 0x5fc   :  { %4194 = vrcp.f32 %v1008_v25 }
 0x5ff   :  { %v1326_v30 = vpop.permute.xlu0 %1325 }
 0x600   :  { %v4189_v26 = vpop.eup %4188  ;;  %v1331_v34 = vsel %vm100_vm0, %v1326_v30, 0 }
 0x601   :  { %v1019_v27 = vmul.f32 %v4189_v26, %v4618_v49  ;;  %v4191_v32 = vpop.eup %4190 }
 0x602   :  { %v1020_v37 = vmul.f32 %v4191_v32, %v4600_v28 }
 0x603   :  { %v1225_v31 = vpack.c.bf16 %v1019_v27, %v1019_v27 }
 0x604   :  { %v1323_v42 = vpack.c.bf16 %v1020_v37, %v1020_v37 }
 0x605   :  { %v4193_v33 = vpop.eup %4192  ;;  %3889 = vmatmul.mubr.msk.bf16.vlgmr.msra.gmra.mxu0 %vm297_vm6, %v1225_v31 }
 0x606   :  { %3899 = vmatpush3.bf16.msra.mxu0 %v1331_v34  ;;  %v1023_v35 = vmul.f32 %v4193_v33, %v4622_v51  ;;  %3900 = vmatprep.mubr.msk.bf16.mxu0 %vm4278_vm5, %v4277_v6 }
 0x607   :  { %3910 = vmatprep.subr.bf16.mxu0 %v4277_v6 }
 0x608   :  { %v1226_v39 = vpack.c.bf16 %v1023_v35, %v1023_v35 }
 0x609   :  { %v4195_v40 = vpop.eup %4194 }
 0x60a   :  { %3895 = vmatmul.mubr.msk.bf16.vlgmr.msra.gmra.mxu1 %vm297_vm6, %v1226_v39  ;;  %v1024_v43 = vmul.f32 %v4195_v40, %v4626_v53 }
 0x60b   :  { %3905 = vmatpush3.bf16.msra.mxu1 %v1379_v41  ;;  %3906 = vmatprep.mubr.msk.bf16.mxu1 %vm4278_vm5, %v4277_v6 }
 0x60c   :  { %3918 = vmatprep.subr.bf16.mxu1 %v4277_v6  ;;  %v1324_v28 = vpack.c.bf16 %v1024_v43, %v1024_v43  ;;  %v4696_v43 = vsub.s32 1, %v4473_v61 }
 0x60d   :  { %3901 = vmatmul.mubr.msk.bf16.vlgmr.msra.gmra.mxu0 %vm297_vm6, %v1323_v42 }
 0x60e   :  { %3914 = vmatprep.mubr.msk.bf16.mxu0 %vm4278_vm5, %v4277_v6  ;;  %3911 = vmatpush3.bf16.msra.mxu0 %v4142_v2 }
 0x60f   :  { %3912 = vmatprep.subr.bf16.mxu0 %v4277_v6 }
 0x612   :  { %3907 = vmatmul.mubr.msk.bf16.vlgmr.msra.gmra.mxu1 %vm297_vm6, %v1324_v28  ;;  %3913 = vmatpush3.bf16.msra.mxu0 %v4143_v8  ;;  %v1461_v28 = vrot.slane %v4481_v63, %v4696_v43 }
 0x613   :  { %3922 = vmatprep.mubr.msk.bf16.mxu1 %vm4278_vm5, %v4277_v6  ;;  %3926 = vmatprep.subr.bf16.mxu0 %v4277_v6 }
 0x680   :  { %v1072_v44 = vpop.f32.mrf.mxu0 }
 0x682   :  { %v3866_v45 = vpop.f32.mrf.mxu0 }
 0x684   :  { %v1075_v46 = vpop.f32.mrf.mxu0 }
 0x686   :  { %v3867_v47 = vpop.f32.mrf.mxu0 }
 0x68d   :  { %v1121_v48 = vpop.f32.mrf.mxu1 }
 0x68f   :  { %v3872_v49 = vpop.f32.mrf.mxu1 }
 0x690   :  { %v1171_v50 = vpop.f32.mrf.mxu0 }
 0x691   :  { %v1124_v51 = vpop.f32.mrf.mxu1 }
 0x692   :  { %v3878_v52 = vpop.f32.mrf.mxu0 }
 0x693   :  { %v3873_v53 = vpop.f32.mrf.mxu1 }
 0x694   :  { %v1174_v54 = vpop.f32.mrf.mxu0 }
 0x695   :  { %v1219_v55 = vpop.f32.mrf.mxu1 }
 0x696   :  { %v4110_v56 = vpack.i.bf16 %v1219_v55, %v1171_v50  ;;  %v3879_v57 = vpop.f32.mrf.mxu0 }
 0x697   :  { %v3884_v60 = vpop.f32.mrf.mxu1 }
 0x698   :  { %4111 = vrot.lane.b32.xlu0 %v4110_v56, %s4290_s28 }
 0x699   :  { %v1222_v0 = vpop.f32.mrf.mxu1 }
 0x69b   :  { %v3885_v1 = vpop.f32.mrf.mxu1 }
 0x6c5   :  { %v1269_v3 = vpop.f32.mrf.mxu0 }
 0x6c7   :  { %v3890_v4 = vpop.f32.mrf.mxu0 }
 0x6c8   :  { %v4145_v4 = vld [vmem:[%s5085_s8] sm:$0xff]  }
 0x6c9   :  { %v1272_v7 = vpop.f32.mrf.mxu0 }
 0x6ca   :  { %v1317_v9 = vpop.f32.mrf.mxu1 }
 0x6cb   :  { %v4115_v10 = vpack.i.bf16 %v1317_v9, %v1269_v3  ;;  %v3891_v11 = vpop.f32.mrf.mxu0 }
 0x6cc   :  { %v3896_v12 = vpop.f32.mrf.mxu1 }
 0x6cd   :  { %v1367_v13 = vpop.f32.mrf.mxu0  ;;  %4116 = vrot.lane.b32.xlu1 %v4115_v10, %s5096_s24 }
 0x6ce   :  { %v1320_v14 = vpop.f32.mrf.mxu1 }
 0x6cf   :  { %v3902_v15 = vpop.f32.mrf.mxu0 }
 0x6d0   :  { %v3897_v16 = vpop.f32.mrf.mxu1 }
 0x6d1   :  { %v1370_v17 = vpop.f32.mrf.mxu0 }
 0x6d2   :  { %v1415_v19 = vpop.f32.mrf.mxu1 }
 0x6d3   :  { %v4120_v20 = vpack.i.bf16 %v1415_v19, %v1367_v13  ;;  %v3903_v21 = vpop.f32.mrf.mxu0  ;;  %v4717_v13 = vld [vmem:[%s5088_s11] sm:$0xf] }
 0x6d4   :  { %v3908_v5 = vpop.f32.mrf.mxu1  ;;  %v1549_v16 = vrot.slane %v4717_v13, %v4476_v62  ;;  %v1555_v21 = vrot.slane %v4717_v13, %v4696_v43 }
 0x6d5   :  { %4121 = vrot.lane.b32.xlu0 %v4120_v20, %s5095_s3 }
 0x6d6   :  { %v1418_v22 = vpop.f32.mrf.mxu1 }
 0x6d8   :  { %v3909_v23 = vpop.f32.mrf.mxu1 }
 0x70a   :  { %v4112_v24 = vpop.permute.xlu0 %4111 }
 0x70b   :  { %v4114_v26 = vunpack.i.h.bf16 %v4112_v24  ;;  %v4113_v27 = vunpack.i.l.bf16 %v4112_v24 }
 0x70d   :  { %v1446_v33 = vsel %vm297_vm6, %v1121_v48, %v4114_v26  ;;  %v1445_v34 = vsel %vm297_vm6, %v1072_v44, %v4113_v27  ;;  %v4147_v26 = vld [vmem:[%s5086_s9 + $0x10] sm:$0xff]   ;;  %v4148_v27 = vld [vmem:[%s5086_s9 + $0x8] sm:$0xff]  }
 0x73f   :  { %v4117_v25 = vpop.permute.xlu1 %4116 }
 0x740   :  { %v4119_v30 = vunpack.i.h.bf16 %v4117_v25  ;;  %v4118_v31 = vunpack.i.l.bf16 %v4117_v25  ;;  %v4146_v25 = vld [vmem:[%s5086_s9 + $0x18] sm:$0xff]  }
 0x742   :  { %v1449_v37 = vsel %vm1447_vm7, %v1446_v33, %v4119_v30  ;;  %v1448_v39 = vsel %vm1447_vm7, %v1445_v34, %v4118_v31  ;;  %v4149_v30 = vld [vmem:[%s5086_s9] sm:$0xff]   ;;  %v4743_v31 = vsub.s32 2, %v4473_v61 }
 0x747   :  { %v4122_v32 = vpop.permute.xlu0 %4121 }
 0x748   :  { %v4124_v35 = vunpack.i.h.bf16 %v4122_v32  ;;  %v4123_v36 = vunpack.i.l.bf16 %v4122_v32  ;;  %v1566_v32 = vrot.slane %v4481_v63, %v4743_v31 }
 0x74a   :  { %v1452_v40 = vsel %vm1450_vm8, %v1449_v37, %v4124_v35  ;;  %v1451_v41 = vsel %vm1450_vm8, %v1448_v39, %v4123_v36 }
 0x74b   :  { %v1453_v42 = vpack.c.bf16 %v1452_v40, %v1451_v41 }
 0x74d   :  { %3915 = vmatmul.mubr.msk.bf16.vlgmr.msra.gmra.mxu0 %vm181_vm4, %v1453_v42 }
 0x74e   :  { %3934 = vmatprep.mubr.msk.bf16.mxu0 %vm4278_vm5, %v4277_v6  ;;  %3927 = vmatpush3.bf16.msra.mxu0 %v4146_v25 }
 0x74f   :  { %3928 = vmatprep.subr.bf16.mxu0 %v4277_v6 }
 0x752   :  { %3929 = vmatpush3.bf16.msra.mxu0 %v4147_v26 }
 0x753   :  { %3930 = vmatprep.subr.bf16.mxu0 %v4277_v6 }
 0x756   :  { %3931 = vmatpush3.bf16.msra.mxu0 %v4148_v27 }
 0x757   :  { %3932 = vmatprep.subr.bf16.mxu0 %v4277_v6 }
 0x75a   :  { %3933 = vmatpush3.bf16.msra.mxu0 %v4149_v30 }
 0x75b   :  { %3956 = vmatprep.subr.mxu0 %v4277_v6 }
 0x80d   :  { %v1511_v44 = vpop.f32.mrf.mxu0 }
 0x80e   :  { %v1512_v45 = vadd.f32 %v1511_v44, %v1461_v28 }
 0x80f   :  { %v3916_v46 = vpop.f32.mrf.mxu0 }
 0x810   :  { %v1518_v47 = vadd.f32 %v1512_v45, %v4463_v58 }
 0x811   :  { %v1514_v48 = vpop.f32.mrf.mxu0 }
 0x812   :  { %v1515_v49 = vadd.f32 %v1514_v48, %v1461_v28  ;;  %v1520_v50 = vsel %vm181_vm4, %v1518_v47, 0.0 }
 0x813   :  { %1521 = vadd.xlane.f32.xlu1 %v1520_v50  ;;  %v3917_v51 = vpop.f32.mrf.mxu0 }
 0x814   :  { %v1519_v52 = vadd.f32 %v1515_v49, %v4465_v59  ;;  %v4144_v59 = vld [vmem:[%s5085_s8 + $0x8] sm:$0xff]  }
 0x815   :  { %3919 = vmatpush3.bf16.msra.mxu1 %v4144_v59 }
 0x816   :  { %v1523_v53 = vsel %vm181_vm4, %v1519_v52, 0.0  ;;  %3920 = vmatprep.subr.bf16.mxu1 %v4277_v6 }
 0x817   :  { %1524 = vadd.xlane.f32.xlu0 %v1523_v53 }
 0x819   :  { %3921 = vmatpush3.bf16.msra.mxu1 %v4145_v4 }
 0x81a   :  { %3938 = vmatprep.subr.bf16.mxu1 %v4277_v6 }
 0x89c   :  { %v1522_v54 = vpop.xlane.xlu1 %1521 }
 0x89d   :  { %v1526_v55 = vmul.f32 0.03125, %v1522_v54 }
 0x89f   :  { %v1528_v56 = vsub.f32 %v1518_v47, %v1526_v55 }
 0x8a0   :  { %v1525_v57 = vpop.xlane.xlu0 %1524 }
 0x8a1   :  { %v1527_v60 = vmul.f32 0.03125, %v1525_v57  ;;  %v1530_v0 = vmul.f32 %v1528_v56, %v1528_v56 }
 0x8a3   :  { %v1529_v1 = vsub.f32 %v1519_v52, %v1527_v60  ;;  %v1532_v58 = vsel %vm181_vm4, %v1530_v0, 0.0  ;;  %v4751_v0 = vsub.s32 3, %v4473_v61 }
 0x8a4   :  { %1533 = vadd.xlane.f32.xlu0 %v1532_v58 }
 0x8a5   :  { %v1531_v2 = vmul.f32 %v1529_v1, %v1529_v1 }
 0x8a7   :  { %v1535_v3 = vsel %vm181_vm4, %v1531_v2, 0.0 }
 0x8a8   :  { %1536 = vadd.xlane.f32.xlu1 %v1535_v3 }
 0x92d   :  { %v1534_v7 = vpop.xlane.xlu0 %1533 }
 0x92e   :  { %v1538_v8 = vmul.f32 0.03125, %v1534_v7 }
 0x930   :  { %v1540_v9 = vadd.f32 1e-05, %v1538_v8 }
 0x931   :  { %v1537_v10 = vpop.xlane.xlu1 %1536 }
 0x932   :  { %4196 = vrsqrt.f32 %v1540_v9  ;;  %v1539_v11 = vmul.f32 0.03125, %v1537_v10 }
 0x934   :  { %v1541_v12 = vadd.f32 1e-05, %v1539_v11 }
 0x936   :  { %4198 = vrsqrt.f32 %v1541_v12 }
 0x93f   :  { %v4197_v14 = vpop.eup %4196 }
 0x940   :  { %v1544_v15 = vmul.f32 %v4197_v14, %v1528_v56 }
 0x942   :  { %v1550_v20 = vmul.f32 %v1549_v16, %v1544_v15 }
 0x943   :  { %v4199_v17 = vpop.eup %4198 }
 0x944   :  { %v1545_v19 = vmul.f32 %v4199_v17, %v1529_v1  ;;  %v1556_v22 = vadd.f32 %v1555_v21, %v1550_v20  ;;  %v1653_v1 = vrot.slane %v4481_v63, %v4751_v0 }
 0x946   :  { %v1551_v5 = vmul.f32 %v1549_v16, %v1545_v19 }
 0x948   :  { %v1557_v23 = vadd.f32 %v1555_v21, %v1551_v5 }
 0x94a   :  { %v1558_v24 = vpack.c.bf16 %v1557_v23, %v1556_v22 }
 0x94c   :  { %3923 = vmatmul.mubr.msk.bf16.vlgmr.msra.gmra.mxu1 %vm181_vm4, %v1558_v24 }
 0x94d   :  { %3942 = vmatprep.mubr.msk.bf16.mxu1 %vm4278_vm5, %v4277_v6 }
 0xa0c   :  { %v1616_v33 = vpop.f32.mrf.mxu1 }
 0xa0d   :  { %v1617_v34 = vadd.f32 %v1616_v33, %v1566_v32 }
 0xa0e   :  { %v3924_v35 = vpop.f32.mrf.mxu1 }
 0xa0f   :  { %v1625_v36 = vmul.f32 0.044715, %v1617_v34  ;;  %v1623_v53 = vmul.f32 0.5, %v1617_v34  ;;  %v1754_v35 = vrot.slane %v4717_v13, %v4743_v31 }
 0xa10   :  { %v1619_v37 = vpop.f32.mrf.mxu1 }
 0xa11   :  { %v1627_v39 = vmul.f32 %v1625_v36, %v1617_v34  ;;  %v1620_v40 = vadd.f32 %v1619_v37, %v1566_v32 }
 0xa12   :  { %v3925_v41 = vpop.f32.mrf.mxu1 }
 0xa13   :  { %v1629_v42 = vmul.f32 %v1627_v39, %v1617_v34  ;;  %v1626_v28 = vmul.f32 0.044715, %v1620_v40  ;;  %v1624_v54 = vmul.f32 0.5, %v1620_v40 }
 0xa15   :  { %v1631_v44 = vadd.f32 %v1629_v42, %v1617_v34  ;;  %v1628_v45 = vmul.f32 %v1626_v28, %v1620_v40 }
 0xa17   :  { %v1633_v46 = vmul.f32 0.7978846, %v1631_v44  ;;  %v1630_v47 = vmul.f32 %v1628_v45, %v1620_v40  ;;  %v4783_v45 = vld [vmem:[%s5087_s10 + $0x4] sm:$0xf] }
 0xa19   :  { %4200 = vtanh.f32 %v1633_v46  ;;  %v1632_v48 = vadd.f32 %v1630_v47, %v1620_v40  ;;  %v1760_v40 = vrot.slane %v4717_v13, %v4751_v0  ;;  %v1776_v13 = vrot.slane %v4783_v45, %v4476_v62 }
 0xa1b   :  { %v1634_v49 = vmul.f32 0.7978846, %v1632_v48 }
 0xa1d   :  { %4202 = vtanh.f32 %v1634_v49 }
 0xa26   :  { %v4201_v50 = vpop.eup %4200 }
 0xa27   :  { %v1637_v51 = vadd.f32 1.0, %v4201_v50 }
 0xa29   :  { %v1639_v56 = vmul.f32 %v1637_v51, %v1623_v53 }
 0xa2a   :  { %v4203_v52 = vpop.eup %4202 }
 0xa2b   :  { %v1638_v55 = vadd.f32 1.0, %v4203_v52 }
 0xa2d   :  { %v1640_v57 = vmul.f32 %v1638_v55, %v1624_v54 }
 0xa2f   :  { %v1641_v60 = vpack.c.bf16 %v1640_v57, %v1639_v56 }
 0xa31   :  { %3935 = vmatmul.mubr.msk.bf16.vlgmr.msra.gmra.mxu0 %vm1678_vm9, %v1641_v60 }
 0xa32   :  { %3958 = vmatprep.mubr.msk.f32.mxu0 %vm4278_vm5, %v4277_v6 }
 0xaf1   :  { %v1716_v58 = vpop.f32.mrf.mxu0 }
 0xaf2   :  { %v1717_v2 = vadd.f32 %v1716_v58, %v1653_v1 }
 0xaf3   :  { %v3936_v3 = vpop.f32.mrf.mxu0 }
 0xaf4   :  { %v1723_v59 = vadd.f32 %v1717_v2, %v1556_v22  ;;  %v4150_v22 = vld [vmem:[%s5083_s6 + $0x18] sm:$0xff]  }
 0xaf5   :  { %v1719_v4 = vpop.f32.mrf.mxu0  ;;  %3939 = vmatpush3.bf16.msra.mxu1 %v4150_v22 }
 0xaf6   :  { %v1720_v7 = vadd.f32 %v1719_v4, %v1653_v1  ;;  %v1725_v8 = vsel %vm181_vm4, %v1723_v59, 0.0  ;;  %3940 = vmatprep.subr.bf16.mxu1 %v4277_v6 }
 0xaf7   :  { %1726 = vadd.xlane.f32.xlu0 %v1725_v8  ;;  %v3937_v9 = vpop.f32.mrf.mxu0 }
 0xaf8   :  { %v1724_v10 = vadd.f32 %v1720_v7, %v1557_v23  ;;  %v4151_v23 = vld [vmem:[%s5083_s6 + $0x10] sm:$0xff]  }
 0xaf9   :  { %3941 = vmatpush3.bf16.msra.mxu1 %v4151_v23 }
 0xafa   :  { %v1728_v11 = vsel %vm181_vm4, %v1724_v10, 0.0  ;;  %3946 = vmatprep.subr.mxu1 %v4277_v6 }
 0xafb   :  { %1729 = vadd.xlane.f32.xlu1 %v1728_v11 }
 0xb80   :  { %v1727_v12 = vpop.xlane.xlu0 %1726 }
 0xb81   :  { %v1731_v14 = vmul.f32 0.03125, %v1727_v12 }
 0xb83   :  { %v1733_v15 = vsub.f32 %v1723_v59, %v1731_v14 }
 0xb84   :  { %v1730_v16 = vpop.xlane.xlu1 %1729 }
 0xb85   :  { %v1732_v17 = vmul.f32 0.03125, %v1730_v16  ;;  %v1735_v63 = vmul.f32 %v1733_v15, %v1733_v15 }
 0xb87   :  { %v1734_v19 = vsub.f32 %v1724_v10, %v1732_v17  ;;  %v1737_v20 = vsel %vm181_vm4, %v1735_v63, 0.0 }
 0xb88   :  { %1738 = vadd.xlane.f32.xlu0 %v1737_v20 }
 0xb89   :  { %v1736_v21 = vmul.f32 %v1734_v19, %v1734_v19 }
 0xb8b   :  { %v1740_v5 = vsel %vm181_vm4, %v1736_v21, 0.0 }
 0xb8c   :  { %1741 = vadd.xlane.f32.xlu1 %v1740_v5 }
 0xc11   :  { %v1739_v24 = vpop.xlane.xlu0 %1738 }
 0xc12   :  { %v1743_v25 = vmul.f32 0.03125, %v1739_v24 }
 0xc14   :  { %v1745_v26 = vadd.f32 1e-05, %v1743_v25 }
 0xc15   :  { %v1742_v27 = vpop.xlane.xlu1 %1741 }
 0xc16   :  { %4204 = vrsqrt.f32 %v1745_v26  ;;  %v1744_v30 = vmul.f32 0.03125, %v1742_v27 }
 0xc18   :  { %v1746_v32 = vadd.f32 1e-05, %v1744_v30 }
 0xc1a   :  { %4206 = vrsqrt.f32 %v1746_v32 }
 0xc23   :  { %v4205_v33 = vpop.eup %4204 }
 0xc24   :  { %v1749_v34 = vmul.f32 %v4205_v33, %v1733_v15 }
 0xc26   :  { %v1755_v39 = vmul.f32 %v1754_v35, %v1749_v34 }
 0xc27   :  { %v4207_v36 = vpop.eup %4206 }
 0xc28   :  { %v1750_v37 = vmul.f32 %v4207_v36, %v1734_v19  ;;  %v4771_v42 = vadd.f32 %v1760_v40, %v1755_v39 }
 0xc2a   :  { %v1756_v41 = vmul.f32 %v1754_v35, %v1750_v37 }
 0xc2c   :  { %v4773_v28 = vadd.f32 %v1760_v40, %v1756_v41 }
 0xc2e   :  { %v1767_v44 = vpack.c.bf16 %v4773_v28, %v4771_v42 }
 0xc30   :  { %3943 = vmatmul.mubr.msk.bf16.vlgmr.msra.gmra.mxu1 %vm181_vm4, %v1767_v44 }
 0xc31   :  { %3948 = vmatprep.mubr.msk.f32.mxu1 %vm4278_vm5, %v4277_v6 }
 0xcf0   :  { %v1826_v46 = vpop.f32.mrf.mxu1 }
 0xcf1   :  { %v1827_v47 = vadd.f32 %v1826_v46, %v1776_v13 }
 0xcf2   :  { %v3944_v48 = vpop.f32.mrf.mxu1 }
 0xcf3   :  { %1834 = vrot.lane.b32.xlu0 %v1827_v47, %s4279_s17  ;;  %v4800_v52 = vpack.c.bf16 %v1827_v47, %v1827_v47 }
 0xcf4   :  { %v1829_v49 = vpop.f32.mrf.mxu1 }
 0xcf5   :  { %v1830_v50 = vadd.f32 %v1829_v49, %v1776_v13 }
 0xcf6   :  { %v3945_v51 = vpop.f32.mrf.mxu1 }
 0xcf7   :  { %2067 = vrot.lane.b32.xlu0 %v1830_v50, %s4280_s18  ;;  %1911 = vrot.lane.b32.xlu1 %v1830_v50, %s4279_s17  ;;  %v4805_v53 = vpack.c.bf16 %v1830_v50, %v1830_v50 }
 0xcfb   :  { %2065 = vrot.lane.b32.xlu0 %v1830_v50, %s4281_s19  ;;  %1989 = vrot.lane.b32.xlu1 %v1827_v47, %s4280_s18 }
 0xcff   :  { %2223 = vrot.lane.b32.xlu0 %v1830_v50, %s4284_s2  ;;  %1987 = vrot.lane.b32.xlu1 %v1827_v47, %s4281_s19 }
 0xd03   :  { %2221 = vrot.lane.b32.xlu0 %v1830_v50, %s4285_s22  ;;  %2145 = vrot.lane.b32.xlu1 %v1827_v47, %s4284_s2 }
 0xd07   :  { %2379 = vrot.lane.b32.xlu0 %v1830_v50, %s4282_s20  ;;  %2143 = vrot.lane.b32.xlu1 %v1827_v47, %s4285_s22 }
 0xd0b   :  { %2377 = vrot.lane.b32.xlu0 %v1830_v50, %s4283_s21  ;;  %2301 = vrot.lane.b32.xlu1 %v1827_v47, %s4282_s20  ;;  %s5099_s20 = smov 16  }
 0xd0f   :  { %2556 = vrot.lane.b32.xlu0 %v4800_v52, %s4286_s23  ;;  %2299 = vrot.lane.b32.xlu1 %v1827_v47, %s4283_s21  ;;  %s5100_s21 = smov 24  }
 0xd13   :  { %2605 = vrot.lane.b32.xlu1 %v4805_v53, %s4286_s23 }
 0xd65   :  { %v1835_v54 = vpop.permute.xlu0 %1834 }
 0xd66   :  { %3947 = vmatpush3.xpose.msk.msra.mxu1 %vm297_vm6, %v1835_v54 }
 0xd67   :  { %3951 = vmatprep.subr.mxu1 %v4277_v6 }
 0xd69   :  { %3949 = vmatmul.mubr.msk.f32.vlgmr.msra.gmra.mxu1 %vm297_vm6, %v1827_v47  ;;  %v2068_v55 = vpop.permute.xlu0 %2067  ;;  %v1912_v56 = vpop.permute.xlu1 %1911 }
 0xd6a   :  { %3952 = vmatpush3.xpose.msk.msra.mxu1 %vm297_vm6, %v1912_v56  ;;  %3953 = vmatprep.mubr.msk.f32.mxu1 %vm4278_vm5, %v4277_v6 }
 0xd6b   :  { %3961 = vmatprep.subr.mxu1 %v4277_v6 }
 0xd6d   :  { %v2066_v57 = vpop.permute.xlu0 %2065  ;;  %3954 = vmatmul.mubr.msk.f32.vlgmr.msra.gmra.mxu1 %vm297_vm6, %v1830_v50  ;;  %v1990_v60 = vpop.permute.xlu1 %1989 }
 0xd6e   :  { %3957 = vmatpush3.xpose.msk.msra.mxu0 %vm297_vm6, %v1990_v60  ;;  %3962 = vmatpush3.xpose.msk.msra.mxu1 %vm297_vm6, %v2068_v55 }
 0xd6f   :  { %3963 = vmatprep.mubr.msk.f32.mxu1 %vm4278_vm5, %v4277_v6  ;;  %3971 = vmatprep.subr.mxu1 %v4277_v6 }
 0xd70   :  { %3966 = vmatprep.subr.mxu0 %v4277_v6 }
 0xd71   :  { %v2224_v1 = vpop.permute.xlu0 %2223  ;;  %3964 = vmatmul.mubr.msk.f32.vlgmr.msra.gmra.mxu1 %vm297_vm6, %v2066_v57  ;;  %v1988_v58 = vpop.permute.xlu1 %1987 }
 0xd72   :  { %3959 = vmatmul.mubr.msk.f32.vlgmr.msra.gmra.mxu0 %vm297_vm6, %v1988_v58  ;;  %3972 = vmatpush3.xpose.msk.msra.mxu1 %vm297_vm6, %v2224_v1 }
 0xd73   :  { %3973 = vmatprep.mubr.msk.f32.mxu1 %vm4278_vm5, %v4277_v6  ;;  %3968 = vmatprep.mubr.msk.f32.mxu0 %vm4278_vm5, %v4277_v6 }
 0xd74   :  { %3981 = vmatprep.subr.mxu1 %v4277_v6 }
 0xd75   :  { %v2222_v2 = vpop.permute.xlu0 %2221  ;;  %v2146_v3 = vpop.permute.xlu1 %2145 }
 0xd76   :  { %3967 = vmatpush3.xpose.msk.msra.mxu0 %vm297_vm6, %v2146_v3  ;;  %3974 = vmatmul.mubr.msk.f32.vlgmr.msra.gmra.mxu1 %vm297_vm6, %v2222_v2 }
 0xd77   :  { %3976 = vmatprep.subr.mxu0 %v4277_v6  ;;  %3983 = vmatprep.mubr.msk.f32.mxu1 %vm4278_vm5, %v4277_v6 }
 0xd79   :  { %v2380_v59 = vpop.permute.xlu0 %2379  ;;  %v2144_v4 = vpop.permute.xlu1 %2143 }
 0xd7a   :  { %3969 = vmatmul.mubr.msk.f32.vlgmr.msra.gmra.mxu0 %vm297_vm6, %v2144_v4  ;;  %3982 = vmatpush3.xpose.msk.msra.mxu1 %vm297_vm6, %v2380_v59 }
 0xd7b   :  { %3978 = vmatprep.mubr.msk.f32.mxu0 %vm4278_vm5, %v4277_v6  ;;  %3992 = vmatprep.subr.bf16.mxu1 %v4277_v6 }
 0xd7d   :  { %v2378_v7 = vpop.permute.xlu0 %2377  ;;  %v2302_v8 = vpop.permute.xlu1 %2301 }
 0xd7e   :  { %3977 = vmatpush3.xpose.msk.msra.mxu0 %vm297_vm6, %v2302_v8  ;;  %3984 = vmatmul.mubr.msk.f32.vlgmr.msra.gmra.mxu1 %vm297_vm6, %v2378_v7 }
 0xd7f   :  { %3986 = vmatprep.subr.bf16.mxu0 %v4277_v6  ;;  %3994 = vmatprep.mubr.msk.bf16.mxu1 %vm4278_vm5, %v4277_v6 }
 0xd81   :  { %v2557_v9 = vpop.permute.xlu0 %2556  ;;  %v2300_v10 = vpop.permute.xlu1 %2299 }
 0xd82   :  { %v2562_v11 = vsel %vm100_vm0, %v2557_v9, 0  ;;  %3979 = vmatmul.mubr.msk.f32.vlgmr.msra.gmra.mxu0 %vm297_vm6, %v2300_v10 }
 0xd83   :  { %3987 = vmatpush3.bf16.msra.mxu0 %v2562_v11  ;;  %3988 = vmatprep.mubr.msk.bf16.mxu0 %vm4278_vm5, %v4277_v6 }
 0xd84   :  { %3998 = vmatprep.subr.bf16.mxu0 %v4277_v6 }
 0xd85   :  { %v2606_v12 = vpop.permute.xlu1 %2605 }
 0xd86   :  { %v2611_v14 = vsel %vm100_vm0, %v2606_v12, 0 }
 0xd87   :  { %3993 = vmatpush3.bf16.msra.mxu1 %v2611_v14 }
 0xd88   :  { %4004 = vmatprep.subr.bf16.mxu1 %v4277_v6 }
 0xe29   :  { %v1906_v15 = vpop.f32.mrf.mxu1 }
 0xe2a   :  { %v2455_v16 = vadd.f32 %v1906_v15, %v4559_v29 }
 0xe2b   :  { %v3950_v17 = vpop.f32.mrf.mxu1 }
 0xe2c   :  { %v2463_v63 = vsel %vm297_vm6, %v2455_v16, -inf }
 0xe2d   :  { %2464 = vmax.xlane.f32.xlu1 %v2463_v63  ;;  %v1983_v19 = vpop.f32.mrf.mxu1 }
 0xe2e   :  { %v2459_v27 = vadd.f32 %v1983_v19, %v4567_v38 }
 0xe2f   :  { %v3955_v20 = vpop.f32.mrf.mxu1 }
 0xe30   :  { %v2475_v35 = vsel %vm297_vm6, %v2459_v27, -inf }
 0xe31   :  { %v2139_v21 = vpop.f32.mrf.mxu1 }
 0xe32   :  { %v4856_v5 = vadd.f32 %v2139_v21, %v4567_v38  ;;  %v2061_v22 = vpop.f32.mrf.mxu0 }
 0xe33   :  { %v2456_v23 = vadd.f32 %v2061_v22, %v4559_v29  ;;  %v3965_v24 = vpop.f32.mrf.mxu1 }
 0xe34   :  { %v3960_v25 = vpop.f32.mrf.mxu0  ;;  %v2478_v26 = vsel %vm297_vm6, %v4856_v5, -inf }
 0xe35   :  { %2479 = vmax.xlane.f32.xlu1 %v2478_v26  ;;  %v2466_v30 = vsel %vm297_vm6, %v2456_v23, -inf }
 0xe36   :  { %2467 = vmax.xlane.f32.xlu0 %v2466_v30  ;;  %v2295_v32 = vpop.f32.mrf.mxu1 }
 0xe37   :  { %v2461_v33 = vadd.f32 %v2295_v32, %v4567_v38 }
 0xe38   :  { %v3975_v34 = vpop.f32.mrf.mxu1 }
 0xe39   :  { %v2481_v36 = vsel %vm297_vm6, %v2461_v33, -inf }
 0xe3a   :  { %v2217_v37 = vpop.f32.mrf.mxu0  ;;  %2476 = vmax.xlane.f32.xlu0 %v2475_v35  ;;  %2482 = vmax.xlane.f32.xlu1 %v2481_v36 }
 0xe3b   :  { %v2457_v39 = vadd.f32 %v2217_v37, %v4559_v29 }
 0xe3c   :  { %v3970_v40 = vpop.f32.mrf.mxu0 }
 0xe3d   :  { %v2469_v41 = vsel %vm297_vm6, %v2457_v39, -inf }
 0xe3e   :  { %2470 = vmax.xlane.f32.xlu0 %v2469_v41  ;;  %v2451_v44 = vpop.f32.mrf.mxu1 }
 0xe3f   :  { %v2462_v13 = vadd.f32 %v2451_v44, %v4567_v38 }
 0xe40   :  { %v3985_v46 = vpop.f32.mrf.mxu1 }
 0xe41   :  { %v2484_v47 = vsel %vm297_vm6, %v2462_v13, -inf }
 0xe42   :  { %v2373_v48 = vpop.f32.mrf.mxu0  ;;  %2485 = vmax.xlane.f32.xlu1 %v2484_v47 }
 0xe43   :  { %v2458_v49 = vadd.f32 %v2373_v48, %v4559_v29 }
 0xe44   :  { %v3980_v50 = vpop.f32.mrf.mxu0 }
 0xe45   :  { %v2472_v51 = vsel %vm297_vm6, %v2458_v49, -inf }
 0xe46   :  { %2473 = vmax.xlane.f32.xlu0 %v2472_v51 }
 0xe53   :  { %2655 = vrot.lane.b32.xlu1 %v4800_v52, %s4287_s1 }
 0xe5c   :  { %2703 = vrot.lane.b32.xlu0 %v4805_v53, %s4287_s1 }
 0xeb6   :  { %v2465_v54 = vpop.xlane.xlu1 %2464 }
 0xeb7   :  { %v2487_v55 = vsub.f32 %v2455_v16, %v2465_v54 }
 0xeb9   :  { %v2495_v38 = vmul.f32 1.442695, %v2487_v55 }
 0xebb   :  { %4208 = vpow2.f32 %v2495_v38 }
 0xebe   :  { %v2480_v10 = vpop.xlane.xlu1 %2479 }
 0xebf   :  { %v2468_v56 = vpop.xlane.xlu0 %2467  ;;  %v2492_v14 = vsub.f32 %v4856_v5, %v2480_v10 }
 0xec0   :  { %v2488_v57 = vsub.f32 %v2456_v23, %v2468_v56 }
 0xec1   :  { %v2505_v63 = vmul.f32 1.442695, %v2492_v14 }
 0xec2   :  { %v2497_v60 = vmul.f32 1.442695, %v2488_v57 }
 0xec3   :  { %v2477_v1 = vpop.xlane.xlu0 %2476  ;;  %v2483_v17 = vpop.xlane.xlu1 %2482 }
 0xec4   :  { %4210 = vpow2.f32 %v2497_v60  ;;  %v2491_v29 = vsub.f32 %v2459_v27, %v2477_v1  ;;  %v2493_v19 = vsub.f32 %v2461_v33, %v2483_v17 }
 0xec6   :  { %v2503_v58 = vmul.f32 1.442695, %v2491_v29  ;;  %v2507_v22 = vmul.f32 1.442695, %v2493_v19 }
 0xec7   :  { %v2471_v9 = vpop.xlane.xlu0 %2470 }
 0xec8   :  { %v4209_v2 = vpop.eup %4208  ;;  %4212 = vpow2.f32 %v2503_v58  ;;  %v2489_v11 = vsub.f32 %v2457_v39, %v2471_v9 }
 0xec9   :  { %v2511_v3 = vsel %vm297_vm6, %v4209_v2, 0.0 }
 0xeca   :  { %2512 = vadd.xlane.f32.xlu0 %v2511_v3  ;;  %v2499_v15 = vmul.f32 1.442695, %v2489_v11 }
 0xecb   :  { %v2486_v21 = vpop.xlane.xlu1 %2485 }
 0xecc   :  { %4214 = vpow2.f32 %v2499_v15  ;;  %v2494_v23 = vsub.f32 %v2462_v13, %v2486_v21 }
 0xecd   :  { %4216 = vpow2.f32 %v2505_v63 }
 0xece   :  { %v2509_v24 = vmul.f32 1.442695, %v2494_v23 }
 0xecf   :  { %v2474_v12 = vpop.xlane.xlu0 %2473  ;;  %v2656_v40 = vpop.permute.xlu1 %2655 }
 0xed0   :  { %v2490_v16 = vsub.f32 %v2458_v49, %v2474_v12  ;;  %v2661_v48 = vsel %vm100_vm0, %v2656_v40, 0 }
 0xed1   :  { %v4211_v59 = vpop.eup %4210 }
 0xed2   :  { %v2514_v4 = vsel %vm297_vm6, %v4211_v59, 0.0  ;;  %v2501_v20 = vmul.f32 1.442695, %v2490_v16 }
 0xed3   :  { %2515 = vadd.xlane.f32.xlu0 %v2514_v4  ;;  %v2704_v37 = vpop.permute.xlu0 %2703 }
 0xed4   :  { %4218 = vpow2.f32 %v2501_v20  ;;  %v2709_v56 = vsel %vm100_vm0, %v2704_v37, 0 }
 0xed5   :  { %v4878_v7 = vpop.eup %4212  ;;  %4220 = vpow2.f32 %v2507_v22 }
 0xed6   :  { %v2523_v8 = vsel %vm297_vm6, %v4878_v7, 0.0  ;;  %4222 = vpow2.f32 %v2509_v24 }
 0xed7   :  { %2524 = vadd.xlane.f32.xlu1 %v2523_v8 }
 0xed9   :  { %v4215_v25 = vpop.eup %4214 }
 0xeda   :  { %v4887_v26 = vpop.eup %4216  ;;  %v2517_v5 = vsel %vm297_vm6, %v4215_v25, 0.0 }
 0xedb   :  { %v2526_v32 = vsel %vm297_vm6, %v4887_v26, 0.0 }
 0xee1   :  { %v4890_v27 = vpop.eup %4218 }
 0xee2   :  { %v2520_v30 = vsel %vm297_vm6, %v4890_v27, 0.0  ;;  %v4896_v33 = vpop.eup %4220 }
 0xee3   :  { %v2529_v34 = vsel %vm297_vm6, %v4896_v33, 0.0  ;;  %v4900_v35 = vpop.eup %4222 }
 0xee4   :  { %v2532_v36 = vsel %vm297_vm6, %v4900_v35, 0.0 }
 0xee8   :  { %2753 = vrot.lane.b32.xlu1 %v4800_v52, %s4288_s26 }
 0xee9   :  { %2801 = vrot.lane.b32.xlu0 %v4805_v53, %s4288_s26 }
 0xf08   :  { %2518 = vadd.xlane.f32.xlu0 %v2517_v5 }
 0xf0c   :  { %2521 = vadd.xlane.f32.xlu0 %v2520_v30  ;;  %2527 = vadd.xlane.f32.xlu1 %v2526_v32 }
 0xf10   :  { %2530 = vadd.xlane.f32.xlu1 %v2529_v34 }
 0xf14   :  { %2533 = vadd.xlane.f32.xlu1 %v2532_v36 }
 0xf22   :  { %2899 = vrot.lane.b32.xlu0 %v4805_v53, %s4289_s27 }
 0xf25   :  { %2851 = vrot.lane.b32.xlu1 %v4800_v52, %s4289_s27 }
 0xf53   :  { %v2513_v39 = vpop.xlane.xlu0 %2512 }
 0xf54   :  { %4224 = vrcp.f32 %v2513_v39 }
 0xf5c   :  { %v2516_v41 = vpop.xlane.xlu0 %2515 }
 0xf5d   :  { %4226 = vrcp.f32 %v2516_v41 }
 0xf60   :  { %v2525_v44 = vpop.xlane.xlu1 %2524  ;;  %v2802_v57 = vpop.permute.xlu0 %2801 }
 0xf61   :  { %v4225_v13 = vpop.eup %4224  ;;  %4228 = vrcp.f32 %v2525_v44  ;;  %v2807_v16 = vsel %vm100_vm0, %v2802_v57, 0 }
 0xf62   :  { %v2543_v46 = vmul.f32 %v4225_v13, %v4209_v2 }
 0xf64   :  { %v2551_v47 = vpack.c.bf16 %v2543_v46, %v2543_v46  ;;  %v2754_v49 = vpop.permute.xlu1 %2753  ;;  %v4152_v46 = vld [vmem:[%s5084_s7 + $0x18] sm:$0xff]  }
 0xf65   :  { %v2759_v54 = vsel %vm100_vm0, %v2754_v49, 0 }
 0xf66   :  { %3989 = vmatmul.mubr.msk.bf16.vlgmr.msra.gmra.mxu0 %vm297_vm6, %v2551_v47 }
 0xf67   :  { %3999 = vmatpush3.bf16.msra.mxu0 %v2661_v48  ;;  %4000 = vmatprep.mubr.msk.bf16.mxu0 %vm4278_vm5, %v4277_v6 }
 0xf68   :  { %4010 = vmatprep.subr.bf16.mxu0 %v4277_v6 }
 0xf6a   :  { %v4227_v52 = vpop.eup %4226 }
 0xf6b   :  { %v2544_v53 = vmul.f32 %v4227_v52, %v4211_v59 }
 0xf6d   :  { %v2653_v50 = vpack.c.bf16 %v2544_v53, %v2544_v53 }
 0xf6e   :  { %v4229_v51 = vpop.eup %4228 }
 0xf6f   :  { %4001 = vmatmul.mubr.msk.bf16.vlgmr.msra.gmra.mxu0 %vm297_vm6, %v2653_v50  ;;  %v2547_v55 = vmul.f32 %v4229_v51, %v4878_v7 }
 0xf70   :  { %4011 = vmatpush3.bf16.msra.mxu0 %v2759_v54  ;;  %4012 = vmatprep.mubr.msk.bf16.mxu0 %vm4278_vm5, %v4277_v6 }
 0xf71   :  { %v2552_v38 = vpack.c.bf16 %v2547_v55, %v2547_v55  ;;  %4022 = vmatprep.subr.bf16.mxu0 %v4277_v6  ;;  %v4153_v55 = vld [vmem:[%s5084_s7 + $0x10] sm:$0xff]  }
 0xf73   :  { %3995 = vmatmul.mubr.msk.bf16.vlgmr.msra.gmra.mxu1 %vm297_vm6, %v2552_v38 }
 0xf74   :  { %4005 = vmatpush3.bf16.msra.mxu1 %v2709_v56  ;;  %4006 = vmatprep.mubr.msk.bf16.mxu1 %vm4278_vm5, %v4277_v6 }
 0xf75   :  { %4016 = vmatprep.subr.bf16.mxu1 %v4277_v6 }
 0xf91   :  { %v2519_v60 = vpop.xlane.xlu0 %2518 }
 0xf92   :  { %4230 = vrcp.f32 %v2519_v60 }
 0xf95   :  { %v2522_v1 = vpop.xlane.xlu0 %2521  ;;  %v2528_v29 = vpop.xlane.xlu1 %2527 }
 0xf96   :  { %4232 = vrcp.f32 %v2522_v1 }
 0xf97   :  { %4234 = vrcp.f32 %v2528_v29 }
 0xf99   :  { %v2531_v58 = vpop.xlane.xlu1 %2530  ;;  %v2900_v19 = vpop.permute.xlu0 %2899 }
 0xf9a   :  { %4236 = vrcp.f32 %v2531_v58  ;;  %v2905_v22 = vsel %vm100_vm0, %v2900_v19, 0 }
 0xf9d   :  { %v2534_v2 = vpop.xlane.xlu1 %2533 }
 0xf9e   :  { %4238 = vrcp.f32 %v2534_v2 }
 0xf9f   :  { %v4231_v3 = vpop.eup %4230 }
 0xfa0   :  { %v2545_v59 = vmul.f32 %v4231_v3, %v4215_v25 }
 0xfa1   :  { %v2852_v4 = vpop.permute.xlu1 %2851 }
 0xfa2   :  { %v2857_v7 = vsel %vm100_vm0, %v2852_v4, 0  ;;  %v2751_v8 = vpack.c.bf16 %v2545_v59, %v2545_v59 }
 0xfa3   :  { %v4233_v9 = vpop.eup %4232 }
 0xfa4   :  { %v4235_v10 = vpop.eup %4234  ;;  %4013 = vmatmul.mubr.msk.bf16.vlgmr.msra.gmra.mxu0 %vm297_vm6, %v2751_v8  ;;  %v2546_v12 = vmul.f32 %v4233_v9, %v4890_v27 }
 0xfa5   :  { %4023 = vmatpush3.bf16.msra.mxu0 %v2857_v7  ;;  %v2548_v11 = vmul.f32 %v4235_v10, %v4887_v26  ;;  %4024 = vmatprep.mubr.msk.bf16.mxu0 %vm4278_vm5, %v4277_v6 }
 0xfa6   :  { %4034 = vmatprep.subr.bf16.mxu0 %v4277_v6  ;;  %v2849_v17 = vpack.c.bf16 %v2546_v12, %v2546_v12 }
 0xfa7   :  { %v2654_v14 = vpack.c.bf16 %v2548_v11, %v2548_v11  ;;  %v4237_v15 = vpop.eup %4236 }
 0xfa8   :  { %v2549_v63 = vmul.f32 %v4237_v15, %v4896_v33 }
 0xfa9   :  { %4007 = vmatmul.mubr.msk.bf16.vlgmr.msra.gmra.mxu1 %vm297_vm6, %v2654_v14 }
 0xfaa   :  { %4017 = vmatpush3.bf16.msra.mxu1 %v2807_v16  ;;  %4018 = vmatprep.mubr.msk.bf16.mxu1 %vm4278_vm5, %v4277_v6  ;;  %v2752_v20 = vpack.c.bf16 %v2549_v63, %v2549_v63 }
 0xfab   :  { %4028 = vmatprep.subr.bf16.mxu1 %v4277_v6  ;;  %v4239_v21 = vpop.eup %4238 }
 0xfac   :  { %4025 = vmatmul.mubr.msk.bf16.vlgmr.msra.gmra.mxu0 %vm297_vm6, %v2849_v17  ;;  %v2550_v23 = vmul.f32 %v4239_v21, %v4900_v35 }
 0xfad   :  { %4038 = vmatprep.mubr.msk.bf16.mxu0 %vm4278_vm5, %v4277_v6  ;;  %4035 = vmatpush3.bf16.msra.mxu0 %v4152_v46 }
 0xfae   :  { %v2850_v24 = vpack.c.bf16 %v2550_v23, %v2550_v23  ;;  %4036 = vmatprep.subr.bf16.mxu0 %v4277_v6 }
 0xfb1   :  { %4019 = vmatmul.mubr.msk.bf16.vlgmr.msra.gmra.mxu1 %vm297_vm6, %v2752_v20  ;;  %4037 = vmatpush3.bf16.msra.mxu0 %v4153_v55 }
 0xfb2   :  { %4029 = vmatpush3.bf16.msra.mxu1 %v2905_v22  ;;  %4030 = vmatprep.mubr.msk.bf16.mxu1 %vm4278_vm5, %v4277_v6 }
 0xfb3   :  { %4042 = vmatprep.subr.bf16.mxu1 %v4277_v6  ;;  %4050 = vmatprep.subr.bf16.mxu0 %v4277_v6 }
 0xfb9   :  { %4031 = vmatmul.mubr.msk.bf16.vlgmr.msra.gmra.mxu1 %vm297_vm6, %v2850_v24  ;;  %v2986_v24 = vrot.slane %v4783_v45, %v4696_v43 }
 0xfba   :  { %4046 = vmatprep.mubr.msk.bf16.mxu1 %vm4278_vm5, %v4277_v6 }
0x1026   :  { %v2598_v25 = vpop.f32.mrf.mxu0 }
0x1028   :  { %v3990_v26 = vpop.f32.mrf.mxu0 }
0x102a   :  { %v2601_v5 = vpop.f32.mrf.mxu0 }
0x102c   :  { %v3991_v27 = vpop.f32.mrf.mxu0 }
0x102f   :  { %v2697_v30 = vpop.f32.mrf.mxu0 }
0x1031   :  { %v4002_v32 = vpop.f32.mrf.mxu0 }
0x1033   :  { %v2647_v33 = vpop.f32.mrf.mxu1  ;;  %v2700_v34 = vpop.f32.mrf.mxu0 }
0x1035   :  { %v3996_v36 = vpop.f32.mrf.mxu1  ;;  %v4003_v37 = vpop.f32.mrf.mxu0 }
0x1037   :  { %v2650_v39 = vpop.f32.mrf.mxu1 }
0x1039   :  { %v3997_v35 = vpop.f32.mrf.mxu1 }
0x1064   :  { %v2795_v40 = vpop.f32.mrf.mxu0 }
0x1066   :  { %v4014_v41 = vpop.f32.mrf.mxu0 }
0x1068   :  { %v2798_v44 = vpop.f32.mrf.mxu0 }
0x1069   :  { %v2745_v13 = vpop.f32.mrf.mxu1 }
0x106a   :  { %v4125_v47 = vpack.i.bf16 %v2745_v13, %v2697_v30  ;;  %v4015_v48 = vpop.f32.mrf.mxu0 }
0x106b   :  { %v4008_v52 = vpop.f32.mrf.mxu1 }
0x106c   :  { %4126 = vrot.lane.b32.xlu1 %v4125_v47, %s4290_s28  ;;  %v2893_v53 = vpop.f32.mrf.mxu0  ;;  %v4155_v52 = vld [vmem:[%s5085_s8 + $0x10] sm:$0xff]  }
0x106d   :  { %v2748_v49 = vpop.f32.mrf.mxu1 }
0x106e   :  { %v4026_v50 = vpop.f32.mrf.mxu0 }
0x106f   :  { %v4009_v51 = vpop.f32.mrf.mxu1 }
0x1070   :  { %v2896_v54 = vpop.f32.mrf.mxu0 }
0x1071   :  { %v2843_v38 = vpop.f32.mrf.mxu1 }
0x1072   :  { %v4130_v56 = vpack.i.bf16 %v2843_v38, %v2795_v40  ;;  %v4027_v57 = vpop.f32.mrf.mxu0  ;;  %v4988_v38 = vld [vmem:[%s5088_s11 + $0x4] sm:$0xf] }
0x1073   :  { %v4020_v60 = vpop.f32.mrf.mxu1 }
0x1074   :  { %4131 = vrot.lane.b32.xlu0 %v4130_v56, %s5099_s20  ;;  %v3074_v60 = vrot.slane %v4988_v38, %v4476_v62  ;;  %v4157_v62 = vld [vmem:[%s5086_s9 + $0x30] sm:$0xff]  }
0x1075   :  { %v2846_v1 = vpop.f32.mrf.mxu1 }
0x1077   :  { %v4021_v29 = vpop.f32.mrf.mxu1 }
0x1079   :  { %v2941_v58 = vpop.f32.mrf.mxu1 }
0x107a   :  { %v4135_v2 = vpack.i.bf16 %v2941_v58, %v2893_v53 }
0x107b   :  { %v4032_v3 = vpop.f32.mrf.mxu1 }
0x107c   :  { %4136 = vrot.lane.b32.xlu1 %v4135_v2, %s5100_s21  ;;  %v3080_v2 = vrot.slane %v4988_v38, %v4696_v43  ;;  %v4158_v43 = vld [vmem:[%s5086_s9 + $0x28] sm:$0xff]  }
0x107d   :  { %v2944_v59 = vpop.f32.mrf.mxu1 }
0x107f   :  { %v4033_v4 = vpop.f32.mrf.mxu1 }
0x10de   :  { %v4127_v7 = vpop.permute.xlu1 %4126 }
0x10df   :  { %v4129_v9 = vunpack.i.h.bf16 %v4127_v7  ;;  %v4128_v10 = vunpack.i.l.bf16 %v4127_v7 }
0x10e1   :  { %v2972_v15 = vsel %vm297_vm6, %v2647_v33, %v4129_v9  ;;  %v2971_v16 = vsel %vm297_vm6, %v2598_v25, %v4128_v10  ;;  %v4159_v9 = vld [vmem:[%s5086_s9 + $0x20] sm:$0xff]   ;;  %v3092_v10 = vrot.slane %v4783_v45, %v4743_v31 }
0x10e6   :  { %v4132_v8 = vpop.permute.xlu0 %4131 }
0x10e7   :  { %v4134_v11 = vunpack.i.h.bf16 %v4132_v8  ;;  %v4133_v12 = vunpack.i.l.bf16 %v4132_v8  ;;  %v4156_v8 = vld [vmem:[%s5086_s9 + $0x38] sm:$0xff]  }
0x10e9   :  { %v2974_v19 = vsel %vm1447_vm7, %v2972_v15, %v4134_v11  ;;  %v2973_v20 = vsel %vm1447_vm7, %v2971_v16, %v4133_v12 }
0x10ee   :  { %v4137_v14 = vpop.permute.xlu1 %4136 }
0x10ef   :  { %v4139_v17 = vunpack.i.h.bf16 %v4137_v14  ;;  %v4138_v63 = vunpack.i.l.bf16 %v4137_v14 }
0x10f1   :  { %v2976_v21 = vsel %vm1450_vm8, %v2974_v19, %v4139_v17  ;;  %v2975_v22 = vsel %vm1450_vm8, %v2973_v20, %v4138_v63 }
0x10f2   :  { %v2977_v23 = vpack.c.bf16 %v2976_v21, %v2975_v22 }
0x10f4   :  { %4039 = vmatmul.mubr.msk.bf16.vlgmr.msra.gmra.mxu0 %vm181_vm4, %v2977_v23 }
0x10f5   :  { %4058 = vmatprep.mubr.msk.bf16.mxu0 %vm4278_vm5, %v4277_v6  ;;  %4051 = vmatpush3.bf16.msra.mxu0 %v4156_v8  ;;  %v3280_v8 = vrot.slane %v4988_v38, %v4743_v31  ;;  %v3371_v31 = vld [vmem:[%s5089_s12 + $0x18] sm:$0xff] }
0x10f6   :  { %4052 = vmatprep.subr.bf16.mxu0 %v4277_v6 }
0x10f9   :  { %4053 = vmatpush3.bf16.msra.mxu0 %v4157_v62 }
0x10fa   :  { %4054 = vmatprep.subr.bf16.mxu0 %v4277_v6 }
0x10fd   :  { %4055 = vmatpush3.bf16.msra.mxu0 %v4158_v43 }
0x10fe   :  { %4056 = vmatprep.subr.bf16.mxu0 %v4277_v6 }
0x1101   :  { %4057 = vmatpush3.bf16.msra.mxu0 %v4159_v9  ;;  %v3291_v9 = vmul.u32 8, %v4473_v61  ;;  %v3369_v61 = vld [vmem:[%s5089_s12 + $0x8] sm:$0xff] }
0x1102   :  { %4080 = vmatprep.subr.mxu0 %v4277_v6 }
0x1103   :  { %vm3292_vm10 = vcmp.eq.s32.totalorder %v4429_v18, %v3291_v9  ;;  %v3370_v18 = vld [vmem:[%s5089_s12 + $0x10] sm:$0xff] }
0x11b4   :  { %v3036_v25 = vpop.f32.mrf.mxu0 }
0x11b5   :  { %v3037_v26 = vadd.f32 %v3036_v25, %v2986_v24 }
0x11b6   :  { %v4040_v5 = vpop.f32.mrf.mxu0 }
0x11b7   :  { %v3043_v27 = vadd.f32 %v3037_v26, %v4771_v42 }
0x11b8   :  { %v3039_v30 = vpop.f32.mrf.mxu0 }
0x11b9   :  { %v3040_v32 = vadd.f32 %v3039_v30, %v2986_v24  ;;  %v3045_v33 = vsel %vm181_vm4, %v3043_v27, 0.0 }
0x11ba   :  { %3046 = vadd.xlane.f32.xlu0 %v3045_v33  ;;  %v4041_v34 = vpop.f32.mrf.mxu0 }
0x11bb   :  { %v3044_v36 = vadd.f32 %v3040_v32, %v4773_v28  ;;  %v4154_v28 = vld [vmem:[%s5085_s8 + $0x18] sm:$0xff]  }
0x11bc   :  { %4043 = vmatpush3.bf16.msra.mxu1 %v4154_v28 }
0x11bd   :  { %v3048_v37 = vsel %vm181_vm4, %v3044_v36, 0.0  ;;  %4044 = vmatprep.subr.bf16.mxu1 %v4277_v6 }
0x11be   :  { %3049 = vadd.xlane.f32.xlu1 %v3048_v37 }
0x11c0   :  { %4045 = vmatpush3.bf16.msra.mxu1 %v4155_v52 }
0x11c1   :  { %4062 = vmatprep.subr.mxu1 %v4277_v6 }
0x1243   :  { %v3047_v39 = vpop.xlane.xlu0 %3046 }
0x1244   :  { %v3051_v35 = vmul.f32 0.03125, %v3047_v39 }
0x1246   :  { %v3053_v40 = vsub.f32 %v3043_v27, %v3051_v35 }
0x1247   :  { %v3050_v41 = vpop.xlane.xlu1 %3049 }
0x1248   :  { %v3052_v44 = vmul.f32 0.03125, %v3050_v41  ;;  %v3055_v13 = vmul.f32 %v3053_v40, %v3053_v40 }
0x124a   :  { %v3054_v46 = vsub.f32 %v3044_v36, %v3052_v44  ;;  %v3057_v42 = vsel %vm181_vm4, %v3055_v13, 0.0 }
0x124b   :  { %3058 = vadd.xlane.f32.xlu0 %v3057_v42 }
0x124c   :  { %v3056_v47 = vmul.f32 %v3054_v46, %v3054_v46 }
0x124e   :  { %v3060_v48 = vsel %vm181_vm4, %v3056_v47, 0.0 }
0x124f   :  { %3061 = vadd.xlane.f32.xlu0 %v3060_v48 }
0x12d4   :  { %v3059_v53 = vpop.xlane.xlu0 %3058 }
0x12d5   :  { %v3063_v49 = vmul.f32 0.03125, %v3059_v53 }
0x12d7   :  { %v3065_v50 = vadd.f32 1e-05, %v3063_v49 }
0x12d8   :  { %v3062_v51 = vpop.xlane.xlu0 %3061 }
0x12d9   :  { %4240 = vrsqrt.f32 %v3065_v50  ;;  %v3064_v54 = vmul.f32 0.03125, %v3062_v51 }
0x12db   :  { %v3066_v55 = vadd.f32 1e-05, %v3064_v54 }
0x12dd   :  { %4242 = vrsqrt.f32 %v3066_v55 }
0x12e6   :  { %v4241_v56 = vpop.eup %4240 }
0x12e7   :  { %v3069_v57 = vmul.f32 %v4241_v56, %v3053_v40  ;;  %v3180_v40 = vrot.slane %v4783_v45, %v4751_v0 }
0x12e9   :  { %v3075_v58 = vmul.f32 %v3074_v60, %v3069_v57 }
0x12ea   :  { %v4243_v1 = vpop.eup %4242 }
0x12eb   :  { %v3070_v29 = vmul.f32 %v4243_v1, %v3054_v46  ;;  %v3081_v59 = vadd.f32 %v3080_v2, %v3075_v58 }
0x12ed   :  { %v3076_v3 = vmul.f32 %v3074_v60, %v3070_v29 }
0x12ef   :  { %v3082_v4 = vadd.f32 %v3080_v2, %v3076_v3 }
0x12f1   :  { %v3083_v7 = vpack.c.bf16 %v3082_v4, %v3081_v59 }
0x12f3   :  { %4047 = vmatmul.mubr.msk.bf16.vlgmr.msra.gmra.mxu1 %vm181_vm4, %v3083_v7 }
0x12f4   :  { %4066 = vmatprep.mubr.msk.f32.mxu1 %vm4278_vm5, %v4277_v6 }
0x13b3   :  { %v3142_v11 = vpop.f32.mrf.mxu1 }
0x13b4   :  { %v3143_v12 = vadd.f32 %v3142_v11, %v3092_v10 }
0x13b5   :  { %v4048_v14 = vpop.f32.mrf.mxu1 }
0x13b6   :  { %v3151_v15 = vmul.f32 0.044715, %v3143_v12  ;;  %v3149_v33 = vmul.f32 0.5, %v3143_v12 }
0x13b7   :  { %v3145_v16 = vpop.f32.mrf.mxu1 }
0x13b8   :  { %v3153_v17 = vmul.f32 %v3151_v15, %v3143_v12  ;;  %v3146_v63 = vadd.f32 %v3145_v16, %v3092_v10 }
0x13b9   :  { %v4049_v19 = vpop.f32.mrf.mxu1 }
0x13ba   :  { %v3155_v20 = vmul.f32 %v3153_v17, %v3143_v12  ;;  %v3152_v21 = vmul.f32 0.044715, %v3146_v63  ;;  %v3150_v34 = vmul.f32 0.5, %v3146_v63  ;;  %v3659_v17 = vsel %vm3292_vm10, 1.0, %v4277_v6  ;;  %v3456_v19 = vld [vmem:[%s5091_s14 + $0x18] sm:$0xff] }
0x13bc   :  { %v3157_v22 = vadd.f32 %v3155_v20, %v3143_v12  ;;  %v3154_v23 = vmul.f32 %v3152_v21, %v3146_v63  ;;  %v3286_v12 = vrot.slane %v4988_v38, %v4751_v0  ;;  %v3368_v0 = vld [vmem:[%s5089_s12] sm:$0xff]  ;;  %v3455_v20 = vld [vmem:[%s5091_s14 + $0x10] sm:$0xff]  ;;  %v3454_v21 = vld [vmem:[%s5091_s14 + $0x8] sm:$0xff] }
0x13be   :  { %v3159_v24 = vmul.f32 0.7978846, %v3157_v22  ;;  %v3156_v25 = vmul.f32 %v3154_v23, %v3146_v63  ;;  %v3453_v22 = vld [vmem:[%s5091_s14] sm:$0xff]  ;;  %s4293_s14 = smov [#allocation2]  }
0x13bf   :  { %v3661_v23 = vld [vmem:[%s5090_s13] ss:$0 sm:$0xff]  ;;  %s3545_s11 = sshll.u32 %s4293_s14, 4  ;;  %s3546_s11 = int_to_ptr.vmem [resolvable:$true] %s3545_s11 }
0x13c0   :  { %4244 = vtanh.f32 %v3159_v24  ;;  %v3158_v26 = vadd.f32 %v3156_v25, %v3146_v63  ;;  %s4254_s13 = scalar_lea.vmem %s3546_s11, 32  ;;  %p4259_p1 = scmp.lt.s32.totalorder %s3546_s11, %s3546_s11 }
0x13c1   :  { %p4255_p0 = scmp.ne.s32.totalorder %s3546_s11, %s4254_s13  ;;  %p4260_p2 = scmp.lt.s32.totalorder %s4254_s13, %s4254_s13 }
0x13c2   :  { %v3160_v5 = vmul.f32 0.7978846, %v3158_v26 }
0x13c3   :  { %p4261_p3 = por %p4260_p2, %p4259_p1 }
0x13c4   :  { %4246 = vtanh.f32 %v3160_v5 }
0x13c5   :  { %p4262_p4 = pnand %p4261_p3, %p4255_p0 }
0x13cd   :  { %v4245_v27 = vpop.eup %4244 }
0x13ce   :  { %v3163_v30 = vadd.f32 1.0, %v4245_v27  ;;  %v3663_v27 = vld [vmem:[%s5092_s15] ss:$0 sm:$0xff] }
0x13d0   :  { %v3165_v37 = vmul.f32 %v3163_v30, %v3149_v33 }
0x13d1   :  { %v4247_v32 = vpop.eup %4246 }
0x13d2   :  { %v3164_v36 = vadd.f32 1.0, %v4247_v32 }
0x13d4   :  { %v3166_v39 = vmul.f32 %v3164_v36, %v3150_v34 }
0x13d6   :  { %v3167_v35 = vpack.c.bf16 %v3166_v39, %v3165_v37 }
0x13d8   :  { %4059 = vmatmul.mubr.msk.bf16.vlgmr.msra.gmra.mxu0 %vm1678_vm9, %v3167_v35 }
0x13d9   :  { %4088 = vmatprep.mubr.msk.f32.mxu0 %vm4278_vm5, %v4277_v6  ;;  %4081 = vmatpush3.msra.mxu0 %v3456_v19 }
0x13da   :  { %4082 = vmatprep.subr.mxu0 %v4277_v6 }
0x13db   :  { %4083 = vmatpush3.msra.mxu0 %v3455_v20 }
0x13dc   :  { %4084 = vmatprep.subr.mxu0 %v4277_v6 }
0x13dd   :  { %4085 = vmatpush3.msra.mxu0 %v3454_v21 }
0x13de   :  { %4086 = vmatprep.subr.mxu0 %v4277_v6 }
0x13df   :  { %4087 = vmatpush3.msra.mxu0 %v3453_v22 }
0x1498   :  { %v3242_v41 = vpop.f32.mrf.mxu0 }
0x1499   :  { %v3243_v44 = vadd.f32 %v3242_v41, %v3180_v40 }
0x149a   :  { %v4060_v13 = vpop.f32.mrf.mxu0 }
0x149b   :  { %v3249_v46 = vadd.f32 %v3243_v44, %v3081_v59 }
0x149c   :  { %v3245_v42 = vpop.f32.mrf.mxu0 }
0x149d   :  { %v3246_v47 = vadd.f32 %v3245_v42, %v3180_v40  ;;  %v3251_v48 = vsel %vm181_vm4, %v3249_v46, 0.0 }
0x149e   :  { %3252 = vadd.xlane.f32.xlu0 %v3251_v48  ;;  %v4061_v28 = vpop.f32.mrf.mxu0 }
0x149f   :  { %v3250_v52 = vadd.f32 %v3246_v47, %v3082_v4 }
0x14a1   :  { %v3254_v53 = vsel %vm181_vm4, %v3250_v52, 0.0 }
0x14a2   :  { %3255 = vadd.xlane.f32.xlu1 %v3254_v53 }
0x1527   :  { %v3253_v49 = vpop.xlane.xlu0 %3252 }
0x1528   :  { %v3257_v50 = vmul.f32 0.03125, %v3253_v49 }
0x152a   :  { %v3259_v51 = vsub.f32 %v3249_v46, %v3257_v50 }
0x152b   :  { %v3256_v54 = vpop.xlane.xlu1 %3255 }
0x152c   :  { %v3258_v55 = vmul.f32 0.03125, %v3256_v54  ;;  %v3261_v45 = vmul.f32 %v3259_v51, %v3259_v51 }
0x152e   :  { %v3260_v56 = vsub.f32 %v3250_v52, %v3258_v55  ;;  %v3263_v57 = vsel %vm181_vm4, %v3261_v45, 0.0 }
0x152f   :  { %3264 = vadd.xlane.f32.xlu0 %v3263_v57 }
0x1530   :  { %v3262_v60 = vmul.f32 %v3260_v56, %v3260_v56 }
0x1532   :  { %v3266_v1 = vsel %vm181_vm4, %v3262_v60, 0.0 }
0x1533   :  { %3267 = vadd.xlane.f32.xlu1 %v3266_v1 }
0x15b8   :  { %v3265_v29 = vpop.xlane.xlu0 %3264 }
0x15b9   :  { %v3269_v58 = vmul.f32 0.03125, %v3265_v29 }
0x15bb   :  { %v3271_v2 = vadd.f32 1e-05, %v3269_v58 }
0x15bc   :  { %v3268_v3 = vpop.xlane.xlu1 %3267 }
0x15bd   :  { %4248 = vrsqrt.f32 %v3271_v2  ;;  %v3270_v59 = vmul.f32 0.03125, %v3268_v3 }
0x15bf   :  { %v3272_v4 = vadd.f32 1e-05, %v3270_v59 }
0x15c1   :  { %4250 = vrsqrt.f32 %v3272_v4 }
0x15ca   :  { %v4249_v7 = vpop.eup %4248 }
0x15cb   :  { %v3275_v62 = vmul.f32 %v4249_v7, %v3259_v51 }
0x15cd   :  { %v3281_v14 = vmul.f32 %v3280_v8, %v3275_v62 }
0x15ce   :  { %v4251_v43 = vpop.eup %4250 }
0x15cf   :  { %v3276_v10 = vmul.f32 %v4251_v43, %v3260_v56  ;;  %v3287_v16 = vadd.f32 %v3286_v12, %v3281_v14 }
0x15d1   :  { %v3282_v11 = vmul.f32 %v3280_v8, %v3276_v10 }
0x15d3   :  { %v3288_v15 = vadd.f32 %v3286_v12, %v3282_v11 }
0x15d5   :  { %4063 = vmatpush3.msra.mxu1 %v3288_v15 }
0x15d6   :  { %4064 = vmatprep.subr.mxu1 %v4277_v6 }
0x15d7   :  { %4065 = vmatpush3.msra.mxu1 %v3287_v16 }
0x15d8   :  { %4067 = vmatmul.mubr.msk.f32.vlgmr.msra.gmra.mxu1 %vm1447_vm7, %v3659_v17  ;;  %4069 = vmatprep.subr.mxu1 %v4277_v6 }
0x15d9   :  { %4070 = vmatpush3.msra.mxu1 %v3371_v31  ;;  %4077 = vmatprep.mubr.msk.f32.mxu1 %vm4278_vm5, %v4277_v6 }
0x15da   :  { %4071 = vmatprep.subr.mxu1 %v4277_v6 }
0x15db   :  { %4072 = vmatpush3.msra.mxu1 %v3370_v18 }
0x15dc   :  { %4073 = vmatprep.subr.mxu1 %v4277_v6 }
0x15dd   :  { %4074 = vmatpush3.msra.mxu1 %v3369_v61 }
0x15de   :  { %4075 = vmatprep.subr.mxu1 %v4277_v6 }
0x15df   :  { %4076 = vmatpush3.msra.mxu1 %v3368_v0 }
0x1698   :  { %v3364_v38 = vpop.f32.mrf.mxu1 }
0x1699   :  { %4078 = vmatmul.mubr.msk.f32.vlgmr.msra.gmra.mxu1 %vm181_vm4, %v3364_v38 }
0x169a   :  { %v4068_v63 = vpop.f32.mrf.mxu1 }
0x1759   :  { %v3448_v24 = vpop.f32.mrf.mxu1 }
0x175a   :  { %v3449_v25 = vadd.f32 %v3661_v23, %v3448_v24 }
0x175b   :  { %v4079_v26 = vpop.f32.mrf.mxu1 }
0x175c   :  { %4252 = vtanh.f32 %v3449_v25 }
0x1769   :  { %v4253_v5 = vpop.eup %4252 }
0x176a   :  { %4089 = vmatmul.mubr.msk.f32.vlgmr.msra.gmra.mxu0 %vm181_vm4, %v4253_v5 }
0x182a   :  { %v3533_v30 = vpop.f32.mrf.mxu0 }
0x182b   :  { %v3534_v6 = vadd.f32 %v3663_v27, %v3533_v30 }
0x182c   :  { %v4090_v32 = vpop.f32.mrf.mxu0 }
0x182d   :  { %3538 = vst.msk [vmem:[#allocation2] sm:$0x3] %vm3537_vm11, %v3534_v6 }
0x182e   :  { %4265 = shalt.err (!%p4262_p4)
}
0x182f   :  { %3548 = dma.vmem_to_hbm [thread:$0]  %s3546_s11, 32, %s5093_s16, [#allocation3]  }
0x1830   :  { %4274 = dma.done.wait [#allocation3], 32  }
0x1831   :  { %4275 = vsyncadd [#allocation3], 4294967264 }
0x1832   :  { %3552 = vsyncpa [#allocation3], 1 }

</bundles_post_ra>
